<compile_context>
chip_gen: v5e
topology: v5e:2x2
jax: 0.10.0
libtpu: 0.0.40
codegen_flags: <defaults>
</compile_context>

<pallas_src>
import jax
import jax.numpy as jnp
from jax.experimental import pallas as pl
from jax.experimental.pallas import tpu as pltpu

IN_FEATURES = 28 * 28   # 784  (lane dim pads to 896 in VMEM; accepted, HBM-bound)
OUT_FEATURES = 512
MAX_TM = 1024           # batch-tile cap; bf16 streams keep the footprint v7x-safe


def _round_up(x, m):
    return ((x + m - 1) // m) * m


def linear_relu_kernel(x_ref, w_ref, b_ref, o_ref):
    # x_ref: (tm, 784) bf16   w_ref: (784, 512) bf16   b_ref: (1, 512) f32
    # o_ref: (tm, 512) bf16
    # Native bf16 x bf16 MXU matmul with f32 accumulation; bias + ReLU in f32,
    # single cast to the bf16 output.
    y = jnp.dot(x_ref[...], w_ref[...], preferred_element_type=jnp.float32)
    y = y + b_ref[...]                      # broadcast bias over batch (f32)
    o_ref[...] = jnp.maximum(y, 0.0).astype(o_ref.dtype)


def linear_forward(x_nchw, w_kn_bf16, b):
    """x_nchw: (B, 1, 28, 28) bfloat16 -> (B, 512) bfloat16.

    w_kn_bf16: (784, 512) bfloat16, i.e. the transpose of PyTorch's
    (out_features, in_features) weight, pre-cast once at parameter-init time so
    the kernel computes x @ W_kn + b with a half-width resident weight.
    """
    B = x_nchw.shape[0]
    x_flat = x_nchw.reshape(B, -1)          # nn.Flatten (glue, plain JAX)
    assert x_flat.shape[1] == IN_FEATURES
    b2d = b.reshape(1, OUT_FEATURES).astype(jnp.float32)
    out_dtype = jnp.bfloat16

    # Batch tiling:
    #   * B <= MAX_TM: one full-batch tile (block == full dim is always legal).
    #   * B  > MAX_TM: force an even, balanced grid so the "parallel" batch axis
    #     actually engages both TensorCores on v7x (e.g. B=1536 -> 2 x 768
    #     instead of 1024 + padded 512).
    # Footprint @ tm=1024, bf16 x/out: 2 x-bufs (~3.5 MiB) + 2 out-bufs (2 MiB)
    # + W bf16 double-buffered (~1.5 MiB) + bias  ->  ~7 MiB, well inside the
    # 32 MiB scoped VMEM limit on every generation (incl. v7x's 64 MiB chip).
    if B <= MAX_TM:
        tm = B
        grid_m = 1
    else:
        grid_m = pl.cdiv(B, MAX_TM)
        if grid_m % 2:
            grid_m += 1                     # even tile count -> balanced 2-TC split
        tm = min(MAX_TM, _round_up(pl.cdiv(B, grid_m), 8))
        grid_m = pl.cdiv(B, tm)

    flops = 2 * B * IN_FEATURES * OUT_FEATURES
    bytes_accessed = (
        x_flat.size * x_flat.dtype.itemsize
        + w_kn_bf16.size * w_kn_bf16.dtype.itemsize
        + b2d.size * b2d.dtype.itemsize
        + B * OUT_FEATURES * jnp.dtype(out_dtype).itemsize
    )

    return pl.pallas_call(
        linear_relu_kernel,
        out_shape=jax.ShapeDtypeStruct((B, OUT_FEATURES), out_dtype),
        grid_spec=pltpu.PrefetchScalarGridSpec(
            num_scalar_prefetch=0,
            grid=(grid_m,),
            in_specs=[
                # Batch-tiled activation: pipelines/double-buffers across grid steps.
                pl.BlockSpec((tm, IN_FEATURES), lambda i: (i, 0)),
                # Constant index_map: weight/bias fetched from HBM once, VMEM-resident.
                pl.BlockSpec((IN_FEATURES, OUT_FEATURES), lambda i: (0, 0)),
                pl.BlockSpec((1, OUT_FEATURES), lambda i: (0, 0)),
            ],
            out_specs=pl.BlockSpec((tm, OUT_FEATURES), lambda i: (i, 0)),
        ),
        compiler_params=pltpu.CompilerParams(
            # Batch axis has no cross-iteration dependence -> shard across the
            # two TensorCores on v7x; neutral on single-TC v5e/v6e.
            dimension_semantics=("parallel",),
            vmem_limit_bytes=32 * 1024 * 1024,
        ),
        cost_estimate=pl.CostEstimate(
            flops=flops, bytes_accessed=bytes_accessed, transcendentals=0
        ),
    )(x_flat, w_kn_bf16, b2d)


if __name__ == "__main__":
    key = jax.random.PRNGKey(0)
    kx, kw, kb = jax.random.split(key, 3)

    # Small-but-consistent shapes: batch=2, single channel 28x28 image (NCHW).
    # x arrives in bf16, simulating an upstream layer that already emits bf16
    # (no extra f32->bf16 HBM round trip inside this layer's call).
    B = 2
    x = jax.random.normal(kx, (B, 1, 28, 28), dtype=jnp.float32).astype(jnp.bfloat16)

    # Deterministic init mimicking nn.Linear's default uniform(-1/sqrt(in), 1/sqrt(in)).
    bound = 1.0 / (IN_FEATURES ** 0.5)
    w_kn = jax.random.uniform(
        kw, (IN_FEATURES, OUT_FEATURES), jnp.float32, minval=-bound, maxval=bound
    )
    b = jax.random.uniform(
        kb, (OUT_FEATURES,), jnp.float32, minval=-bound, maxval=bound
    )
    w_bf16 = w_kn.astype(jnp.bfloat16)      # parameter stored/cast once in bf16

    out = linear_forward(x, w_bf16, b)
    out = jax.block_until_ready(out)

    # Reference models the kernel's numerics exactly: bf16-rounded x and W,
    # f32 accumulation, f32 bias add + ReLU, bf16 output rounding.  The stated
    # tolerance therefore covers only kernel error, not dtype policy.
    x_q = x.astype(jnp.float32).reshape(B, -1)
    w_q = w_bf16.astype(jnp.float32)
    ref = jnp.maximum(x_q @ w_q + b, 0.0).astype(jnp.bfloat16)

    assert out.shape == (B, OUT_FEATURES)
    assert out.dtype == jnp.bfloat16
    assert jnp.allclose(
        out.astype(jnp.float32), ref.astype(jnp.float32), atol=2e-2, rtol=2e-2
    )

    print("KERNEL_OK")
</pallas_src>

<mosaic_0001>
module attributes {stable_mosaic.version = 11 : i64} {
  func.func @linear_relu_kernel(%arg0: i32, %arg1: memref<2x784xbf16, #tpu.memory_space<vmem>>, %arg2: memref<784x512xbf16, #tpu.memory_space<vmem>>, %arg3: memref<1x512xf32, #tpu.memory_space<vmem>>, %arg4: memref<2x512xbf16, #tpu.memory_space<vmem>>) attributes {dimension_semantics = [#tpu.dimension_semantics<parallel>], iteration_bounds = array<i64: 1>, scalar_prefetch = 0 : i64, scratch_operands = 0 : i64, tpu.core_type = #tpu.core_type<tc>, window_params = [{transform_indices = @transform_0, window_bounds = array<i64: 2, 784>}, {pipeline_mode = #tpu.pipeline_mode<synchronous>, transform_indices = @transform_1, window_bounds = array<i64: 784, 512>}, {pipeline_mode = #tpu.pipeline_mode<synchronous>, transform_indices = @transform_2, window_bounds = array<i64: 1, 512>}, {transform_indices = @transform_3, window_bounds = array<i64: 2, 512>}]} {
    %c0 = arith.constant 0 : index
    %c0_0 = arith.constant 0 : index
    %0 = vector.load %arg1[%c0, %c0_0] : memref<2x784xbf16, #tpu.memory_space<vmem>>, vector<2x784xbf16>
    %c0_1 = arith.constant 0 : index
    %c0_2 = arith.constant 0 : index
    %1 = vector.load %arg2[%c0_1, %c0_2] : memref<784x512xbf16, #tpu.memory_space<vmem>>, vector<784x512xbf16>
    %cst = arith.constant dense<0.000000e+00> : vector<2x512xf32>
    %2 = tpu.matmul %0, %1, %cst {dimension_numbers = #tpu.dot_dimension_numbers<[1], [0], [0], [1], [0, 0, 1, 1], [], []>} : vector<2x784xbf16>, vector<784x512xbf16>, vector<2x512xf32> -> vector<2x512xf32>
    %c0_3 = arith.constant 0 : index
    %c0_4 = arith.constant 0 : index
    %3 = vector.load %arg3[%c0_3, %c0_4] : memref<1x512xf32, #tpu.memory_space<vmem>>, vector<1x512xf32>
    %4 = vector.broadcast %3 : vector<1x512xf32> to vector<2x512xf32>
    %5 = arith.addf %2, %4 : vector<2x512xf32>
    %cst_5 = arith.constant 0.000000e+00 : f32
    %6 = vector.broadcast %cst_5 : f32 to vector<2x512xf32>
    %7 = arith.maximumf %5, %6 : vector<2x512xf32>
    %8 = arith.truncf %7 : vector<2x512xf32> to vector<2x512xbf16>
    %c0_6 = arith.constant 0 : index
    %c0_7 = arith.constant 0 : index
    %9 = vector.load %arg4[%c0_6, %c0_7] : memref<2x512xbf16, #tpu.memory_space<vmem>>, vector<2x512xbf16>
    tpu.vector_store %arg4[%c0_6, %c0_7], %8 {strides = array<i32>} : memref<2x512xbf16, #tpu.memory_space<vmem>>, vector<2x512xbf16>,
    return
  }
  func.func @transform_0(%arg0: i32) -> (i32, i32) {
    %c0_i32 = arith.constant 0 : i32
    %c0_i32_0 = arith.constant 0 : i32
    return %arg0, %c0_i32 : i32, i32
  }
  func.func @transform_1(%arg0: i32) -> (i32, i32) {
    %c0_i32 = arith.constant 0 : i32
    %c0_i32_0 = arith.constant 0 : i32
    %c0_i32_1 = arith.constant 0 : i32
    return %c0_i32, %c0_i32_0 : i32, i32
  }
  func.func @transform_2(%arg0: i32) -> (i32, i32) {
    %c0_i32 = arith.constant 0 : i32
    %c0_i32_0 = arith.constant 0 : i32
    %c0_i32_1 = arith.constant 0 : i32
    return %c0_i32, %c0_i32_0 : i32, i32
  }
  func.func @transform_3(%arg0: i32) -> (i32, i32) {
    %c0_i32 = arith.constant 0 : i32
    %c0_i32_0 = arith.constant 0 : i32
    return %arg0, %c0_i32 : i32, i32
  }
}

</mosaic_0001>

<bundles_post_ra>
// kernel: tpu_custom_call.1
= control target key start
LH: loop header
LB: loop body
LE: loop exit
PB: predicated region body
PF: predicated region fallthrough
CT: control target
= control target key end

     0   :  { %8 = vsyncpa [#allocation3], 0  ;;  %s2851_s0 = inlined_call_operand.hbm [shape: bf16[2,784], index: 0, kind: input, shape index: {}]   ;;  %s2852_s1 = inlined_call_operand.hbm [shape: bf16[784,512], index: 1, kind: input, shape index: {}]   ;;  %s2853_s2 = inlined_call_operand.hbm [shape: f32[1,512], index: 2, kind: input, shape index: {}]   ;;  %s2854_s3 = inlined_call_operand.hbm [shape: bf16[2,512], index: 3, kind: output, shape index: {}]  }
   0x1   :  { %9 = vsyncpa [#allocation6], 0  ;;  %s26_s14 = sshll.u32 %s2852_s1, 4  ;;  %s27_s14 = int_to_ptr.hbm [resolvable:$true] %s26_s14 }
   0x2   :  { %10 = vsyncpa [#allocation4], 0  ;;  %s2768_s15 = smov [#allocation5]   ;;  %s16_s19 = sshll.u32 %s2851_s0, 4  ;;  %s17_s19 = int_to_ptr.hbm [resolvable:$true] %s16_s19 }
   0x3   :  { %s28_s16 = sshll.u32 %s2768_s15, 4  ;;  %s2769_s20 = smov 256   ;;  %s29_s16 = int_to_ptr.vmem [resolvable:$true] %s28_s16 }
   0x4   :  { %s2770_s21 = smov 16   ;;  %s2771_s22 = smov [#allocation2]  }
   0x5   :  { %34 = dma.hbm_to_vmem [thread:$0]  %s27_s14, 25088, %s29_s16, [#allocation6], %s2769_s20, %s2769_s20, %s2770_s21  }
   0x6   :  { %s18_s23 = sshll.u32 %s2771_s22, 4  ;;  %s40_s26 = sshll.u32 %s2853_s2, 4  ;;  %s19_s23 = int_to_ptr.vmem [resolvable:$true] %s18_s23  ;;  %s41_s26 = int_to_ptr.hbm [resolvable:$true] %s40_s26 }
   0x7   :  { %21 = dma.hbm_to_vmem [thread:$0]  %s17_s19, 112, %s19_s23, [#allocation3]  }
   0x8   :  { %s2772_s1 = smov [#allocation7]  }
   0x9   :  { %s42_s27 = sshll.u32 %s2772_s1, 4  ;;  %s43_s27 = int_to_ptr.vmem [resolvable:$true] %s42_s27 }
   0xa   :  { %45 = dma.hbm_to_vmem [thread:$0]  %s41_s26, 64, %s43_s27, [#allocation6]  }
   0xb   :  { %2762 = dma.done.wait [#allocation3], 112  }
   0xc   :  { %2763 = vsyncadd [#allocation3], 4294967184 }
   0xd   :  { %2764 = dma.done.wait [#allocation6], 25152  }
   0xe   :  { %2765 = vsyncadd [#allocation6], 4294942144  ;;  %v1783_v0 = vld [vmem:[#allocation5 + $0xe0] sm:$0xf]  ;;  %v2487_v1 = vld [vmem:[#allocation5 + $0xec] sm:$0xf0] }
   0xf   :  { %v1911_v2 = vld [vmem:[#allocation5 + $0x1e0] sm:$0xf]  ;;  %v1784_v3 = vor.u32 %v2487_v1, %v1783_v0  ;;  %v2519_v4 = vld [vmem:[#allocation5 + $0x1ec] sm:$0xf0]  ;;  %vm1261_vm0 = vcmask 130048   ;;  %vm1639_vm1 = vcmask 1040384  }
  0x10   :  { %v2039_v5 = vld [vmem:[#allocation5 + $0x2e0] sm:$0xf]  ;;  %v2551_v6 = vld [vmem:[#allocation5 + $0x2ec] sm:$0xf0]  ;;  %v1912_v7 = vor.u32 %v2519_v4, %v1911_v2  ;;  %vm1643_vm2 = vcmask 1042434   ;;  %s2773_s0 = smov [#allocation8]  }
  0x11   :  { %v2040_v8 = vor.u32 %v2551_v6, %v2039_v5  ;;  %v2167_v9 = vld [vmem:[#allocation5 + $0x3e0] sm:$0xf]  ;;  %v2583_v10 = vld [vmem:[#allocation5 + $0x3ec] sm:$0xf0]  ;;  %1264 = vmatpush.bf16.msra.mxu0 %v1784_v3  ;;  %s1656_s2 = sshll.u32 %s2773_s0, 4  ;;  %s1658_s30 = sshll.u32 %s2854_s3, 4  ;;  %s1657_s2 = int_to_ptr.vmem [resolvable:$true] %s1656_s2  ;;  %s1659_s30 = int_to_ptr.hbm [resolvable:$true] %s1658_s30 }
  0x12   :  { %v1767_v11 = vld [vmem:[#allocation5 + $0xc0] sm:$0xf]  ;;  %v2168_v12 = vor.u32 %v2583_v10, %v2167_v9  ;;  %v2483_v13 = vld [vmem:[#allocation5 + $0xcc] sm:$0xf0]  ;;  %1277 = vmatpush.bf16.msra.mxu1 %v1912_v7  ;;  %vm1647_vm3 = vcmask 1041408  }
  0x13   :  { %v1895_v14 = vld [vmem:[#allocation5 + $0x1c0] sm:$0xf]  ;;  %v2515_v15 = vld [vmem:[#allocation5 + $0x1cc] sm:$0xf0]  ;;  %1290 = vmatpush.bf16.msra.mxu2 %v2040_v8  ;;  %v1768_v16 = vor.u32 %v2483_v13, %v1767_v11 }
  0x14   :  { %v1896_v17 = vor.u32 %v2515_v15, %v1895_v14  ;;  %v2023_v18 = vld [vmem:[#allocation5 + $0x2c0] sm:$0xf]  ;;  %v2547_v19 = vld [vmem:[#allocation5 + $0x2cc] sm:$0xf0]  ;;  %1303 = vmatpush.bf16.msra.mxu3 %v2168_v12 }
  0x15   :  { %v2151_v20 = vld [vmem:[#allocation5 + $0x3c0] sm:$0xf]  ;;  %v2024_v21 = vor.u32 %v2547_v19, %v2023_v18  ;;  %v2579_v22 = vld [vmem:[#allocation5 + $0x3cc] sm:$0xf0]  ;;  %1265 = vmatpush.bf16.msra.mxu0 %v1768_v16 }
  0x16   :  { %v1751_v23 = vld [vmem:[#allocation5 + $0xa0] sm:$0xf]  ;;  %v2479_v24 = vld [vmem:[#allocation5 + $0xac] sm:$0xf0]  ;;  %v2152_v25 = vor.u32 %v2579_v22, %v2151_v20  ;;  %1278 = vmatpush.bf16.msra.mxu1 %v1896_v17  ;;  %v59_v20 = vld [vmem:[#allocation2] sm:$0x7f] }
  0x17   :  { %v1879_v26 = vld [vmem:[#allocation5 + $0x1a0] sm:$0xf]  ;;  %v2511_v27 = vld [vmem:[#allocation5 + $0x1ac] sm:$0xf0]  ;;  %v1752_v29 = vor.u32 %v2479_v24, %v1751_v23  ;;  %1291 = vmatpush.bf16.msra.mxu2 %v2024_v21  ;;  %267 = vst [vmem:[#allocation1] ss:$9 sm:$0xff] %v59_v20 }
  0x18   :  { %v2007_v28 = vld [vmem:[#allocation5 + $0x2a0] sm:$0xf]  ;;  %v2543_v30 = vld [vmem:[#allocation5 + $0x2ac] sm:$0xf0]  ;;  %v1880_v33 = vor.u32 %v2511_v27, %v1879_v26  ;;  %1304 = vmatpush.bf16.msra.mxu3 %v2152_v25  ;;  %v1865_v20 = vld [vmem:[#allocation5 + $0x190] sm:$0xf0] }
  0x19   :  { %v2135_v31 = vld [vmem:[#allocation5 + $0x3a0] sm:$0xf]  ;;  %v2575_v32 = vld [vmem:[#allocation5 + $0x3ac] sm:$0xf0]  ;;  %v2008_v34 = vor.u32 %v2543_v30, %v2007_v28  ;;  %1266 = vmatpush.bf16.msra.mxu0 %v1752_v29 }
  0x1a   :  { %v1735_v35 = vld [vmem:[#allocation5 + $0x80] sm:$0xf]  ;;  %v2475_v36 = vld [vmem:[#allocation5 + $0x8c] sm:$0xf0]  ;;  %v2136_v38 = vor.u32 %v2575_v32, %v2135_v31  ;;  %1279 = vmatpush.bf16.msra.mxu1 %v1880_v33 }
  0x1b   :  { %v1863_v37 = vld [vmem:[#allocation5 + $0x180] sm:$0xf]  ;;  %v2507_v39 = vld [vmem:[#allocation5 + $0x18c] sm:$0xf0]  ;;  %v1736_v44 = vor.u32 %v2475_v36, %v1735_v35  ;;  %1292 = vmatpush.bf16.msra.mxu2 %v2008_v34  ;;  %v2485_v34 = vld [vmem:[#allocation5 + $0xe4] sm:$0xf] }
  0x1c   :  { %v1991_v40 = vld [vmem:[#allocation5 + $0x280] sm:$0xf]  ;;  %v2539_v41 = vld [vmem:[#allocation5 + $0x28c] sm:$0xf0]  ;;  %v1864_v45 = vor.u32 %v2507_v39, %v1863_v37  ;;  %1305 = vmatpush.bf16.msra.mxu3 %v2136_v38  ;;  %v1785_v35 = vld [vmem:[#allocation5 + $0xf0] sm:$0xf0] }
  0x1d   :  { %v2119_v42 = vld [vmem:[#allocation5 + $0x380] sm:$0xf]  ;;  %v2571_v43 = vld [vmem:[#allocation5 + $0x38c] sm:$0xf0]  ;;  %v1992_v46 = vor.u32 %v2539_v41, %v1991_v40  ;;  %1267 = vmatpush.bf16.msra.mxu0 %v1736_v44 }
  0x1e   :  { %v1719_v47 = vld [vmem:[#allocation5 + $0x60] sm:$0xf]  ;;  %v2471_v48 = vld [vmem:[#allocation5 + $0x6c] sm:$0xf0]  ;;  %v2120_v50 = vor.u32 %v2571_v43, %v2119_v42  ;;  %1280 = vmatpush.bf16.msra.mxu1 %v1864_v45  ;;  %v2517_v42 = vld [vmem:[#allocation5 + $0x1e4] sm:$0xf]  ;;  %v1788_v45 = vor.u32 %v2485_v34, %v1785_v35 }
  0x1f   :  { %v1847_v49 = vld [vmem:[#allocation5 + $0x160] sm:$0xf]  ;;  %v2503_v51 = vld [vmem:[#allocation5 + $0x16c] sm:$0xf0]  ;;  %v1720_v56 = vor.u32 %v2471_v48, %v1719_v47  ;;  %1293 = vmatpush.bf16.msra.mxu2 %v1992_v46  ;;  %v1913_v43 = vld [vmem:[#allocation5 + $0x1f0] sm:$0xf0] }
  0x20   :  { %v1975_v52 = vld [vmem:[#allocation5 + $0x260] sm:$0xf]  ;;  %v2535_v53 = vld [vmem:[#allocation5 + $0x26c] sm:$0xf0]  ;;  %v1848_v57 = vor.u32 %v2503_v51, %v1847_v49  ;;  %1306 = vmatpush.bf16.msra.mxu3 %v2120_v50  ;;  %v2481_v50 = vld [vmem:[#allocation5 + $0xc4] sm:$0xf] }
  0x21   :  { %v2103_v54 = vld [vmem:[#allocation5 + $0x360] sm:$0xf]  ;;  %v2567_v55 = vld [vmem:[#allocation5 + $0x36c] sm:$0xf0]  ;;  %v1976_v58 = vor.u32 %v2535_v53, %v1975_v52  ;;  %1268 = vmatpush.bf16.msra.mxu0 %v1720_v56  ;;  %v1769_v51 = vld [vmem:[#allocation5 + $0xd0] sm:$0xf0] }
  0x22   :  { %v1703_v59 = vld [vmem:[#allocation5 + $0x40] sm:$0xf]  ;;  %v2467_v60 = vld [vmem:[#allocation5 + $0x4c] sm:$0xf0]  ;;  %v2104_v62 = vor.u32 %v2567_v55, %v2103_v54  ;;  %1281 = vmatpush.bf16.msra.mxu1 %v1848_v57  ;;  %v1916_v55 = vor.u32 %v2517_v42, %v1913_v43  ;;  %v2513_v57 = vld [vmem:[#allocation5 + $0x1c4] sm:$0xf] }
  0x23   :  { %v1831_v61 = vld [vmem:[#allocation5 + $0x140] sm:$0xf]  ;;  %v2499_v63 = vld [vmem:[#allocation5 + $0x14c] sm:$0xf0]  ;;  %v1704_v4 = vor.u32 %v2467_v60, %v1703_v59  ;;  %1294 = vmatpush.bf16.msra.mxu2 %v1976_v58  ;;  %v1897_v58 = vld [vmem:[#allocation5 + $0x1d0] sm:$0xf0] }
  0x24   :  { %v1959_v0 = vld [vmem:[#allocation5 + $0x240] sm:$0xf]  ;;  %v2531_v1 = vld [vmem:[#allocation5 + $0x24c] sm:$0xf0]  ;;  %v1832_v5 = vor.u32 %v2499_v63, %v1831_v61  ;;  %1307 = vmatpush.bf16.msra.mxu3 %v2104_v62  ;;  %v1772_v61 = vor.u32 %v2481_v50, %v1769_v51 }
  0x25   :  { %v2087_v2 = vld [vmem:[#allocation5 + $0x340] sm:$0xf]  ;;  %v2563_v3 = vld [vmem:[#allocation5 + $0x34c] sm:$0xf0]  ;;  %v1960_v6 = vor.u32 %v2531_v1, %v1959_v0  ;;  %1269 = vmatpush.bf16.msra.mxu0 %v1704_v4 }
  0x26   :  { %v1687_v7 = vld [vmem:[#allocation5 + $0x20] sm:$0xf]  ;;  %v2463_v8 = vld [vmem:[#allocation5 + $0x2c] sm:$0xf0]  ;;  %v2088_v10 = vor.u32 %v2563_v3, %v2087_v2  ;;  %1282 = vmatpush.bf16.msra.mxu1 %v1832_v5  ;;  %v2477_v2 = vld [vmem:[#allocation5 + $0xa4] sm:$0xf]  ;;  %v1900_v5 = vor.u32 %v2513_v57, %v1897_v58 }
  0x27   :  { %v1815_v9 = vld [vmem:[#allocation5 + $0x120] sm:$0xf]  ;;  %v2495_v11 = vld [vmem:[#allocation5 + $0x12c] sm:$0xf0]  ;;  %v1688_v17 = vor.u32 %v2463_v8, %v1687_v7  ;;  %1295 = vmatpush.bf16.msra.mxu2 %v1960_v6  ;;  %v1753_v3 = vld [vmem:[#allocation5 + $0xb0] sm:$0xf0] }
  0x28   :  { %v1943_v12 = vld [vmem:[#allocation5 + $0x220] sm:$0xf]  ;;  %v2527_v13 = vld [vmem:[#allocation5 + $0x22c] sm:$0xf0]  ;;  %v1816_v21 = vor.u32 %v2495_v11, %v1815_v9  ;;  %1308 = vmatpush.bf16.msra.mxu3 %v2088_v10  ;;  %v2509_v7 = vld [vmem:[#allocation5 + $0x1a4] sm:$0xf]  ;;  %v1756_v10 = vor.u32 %v2477_v2, %v1753_v3 }
  0x29   :  { %v2071_v14 = vld [vmem:[#allocation5 + $0x320] sm:$0xf]  ;;  %v2559_v15 = vld [vmem:[#allocation5 + $0x32c] sm:$0xf0]  ;;  %v1944_v22 = vor.u32 %v2527_v13, %v1943_v12  ;;  %1270 = vmatpush.bf16.msra.mxu0 %v1688_v17  ;;  %v1881_v8 = vld [vmem:[#allocation5 + $0x1b0] sm:$0xf0] }
  0x2a   :  { %v1671_v16 = vld [vmem:[#allocation5] sm:$0xf]  ;;  %v2459_v18 = vld [vmem:[#allocation5 + $0xc] sm:$0xf0]  ;;  %v2072_v25 = vor.u32 %v2559_v15, %v2071_v14  ;;  %1283 = vmatpush.bf16.msra.mxu1 %v1816_v21  ;;  %v2473_v15 = vld [vmem:[#allocation5 + $0x84] sm:$0xf]  ;;  %v1884_v17 = vor.u32 %v2509_v7, %v1881_v8 }
  0x2b   :  { %v1799_v19 = vld [vmem:[#allocation5 + $0x100] sm:$0xf]  ;;  %v2491_v23 = vld [vmem:[#allocation5 + $0x10c] sm:$0xf0]  ;;  %v1672_v32 = vor.u32 %v2459_v18, %v1671_v16  ;;  %1296 = vmatpush.bf16.msra.mxu2 %v1944_v22  ;;  %v1737_v16 = vld [vmem:[#allocation5 + $0x90] sm:$0xf0] }
  0x2c   :  { %v1927_v24 = vld [vmem:[#allocation5 + $0x200] sm:$0xf]  ;;  %v2523_v26 = vld [vmem:[#allocation5 + $0x20c] sm:$0xf0]  ;;  %v1800_v36 = vor.u32 %v2491_v23, %v1799_v19  ;;  %1309 = vmatpush.bf16.msra.mxu3 %v2072_v25  ;;  %v2505_v19 = vld [vmem:[#allocation5 + $0x184] sm:$0xf]  ;;  %v1740_v22 = vor.u32 %v2473_v15, %v1737_v16 }
  0x2d   :  { %v2055_v27 = vld [vmem:[#allocation5 + $0x300] sm:$0xf]  ;;  %v2555_v28 = vld [vmem:[#allocation5 + $0x30c] sm:$0xf0]  ;;  %v1928_v37 = vor.u32 %v2523_v26, %v1927_v24  ;;  %1271 = vmatpush.bf16.msra.mxu0 %v1672_v32  ;;  %v1849_v32 = vld [vmem:[#allocation5 + $0x170] sm:$0xf0] }
  0x2e   :  { %v2295_v29 = vld [vmem:[#allocation5 + $0x4e0] sm:$0xf]  ;;  %v2615_v30 = vld [vmem:[#allocation5 + $0x4ec] sm:$0xf0]  ;;  %v2056_v39 = vor.u32 %v2555_v28, %v2055_v27  ;;  %1284 = vmatpush.bf16.msra.mxu1 %v1800_v36  ;;  %v2469_v27 = vld [vmem:[#allocation5 + $0x64] sm:$0xf] }
  0x2f   :  { %v2423_v31 = vld [vmem:[#allocation5 + $0x5e0] sm:$0xf]  ;;  %v2647_v33 = vld [vmem:[#allocation5 + $0x5ec] sm:$0xf0]  ;;  %v2296_v40 = vor.u32 %v2615_v30, %v2295_v29  ;;  %1297 = vmatpush.bf16.msra.mxu2 %v1928_v37  ;;  %v1721_v28 = vld [vmem:[#allocation5 + $0x70] sm:$0xf0]  ;;  %v1868_v29 = vor.u32 %v2505_v19, %v1865_v20 }
  0x30   :  { %v2439_v38 = vld [vmem:[#allocation5 + $0x600] sm:$0xf]  ;;  %v2651_v41 = vld [vmem:[#allocation5 + $0x60c] sm:$0xf0]  ;;  %v2424_v44 = vor.u32 %v2647_v33, %v2423_v31  ;;  %1310 = vmatpush.bf16.msra.mxu3 %v2056_v39  ;;  %v2501_v31 = vld [vmem:[#allocation5 + $0x164] sm:$0xf]  ;;  %v1724_v34 = vor.u32 %v2469_v27, %v1721_v28 }
  0x31   :  { %v2279_v46 = vld [vmem:[#allocation5 + $0x4c0] sm:$0xf]  ;;  %v2611_v47 = vld [vmem:[#allocation5 + $0x4cc] sm:$0xf0]  ;;  %v2440_v53 = vor.u32 %v2651_v41, %v2439_v38  ;;  %1316 = vmatpush.bf16.msrb.mxu0 %v2296_v40  ;;  %v2465_v39 = vld [vmem:[#allocation5 + $0x44] sm:$0xf]  ;;  %v1852_v42 = vor.u32 %v2501_v31, %v1849_v32 }
  0x32   :  { %v2407_v48 = vld [vmem:[#allocation5 + $0x5c0] sm:$0xf]  ;;  %v2643_v49 = vld [vmem:[#allocation5 + $0x5cc] sm:$0xf0]  ;;  %v2280_v56 = vor.u32 %v2611_v47, %v2279_v46  ;;  %1329 = vmatpush.bf16.msrb.mxu1 %v2424_v44  ;;  %v1705_v40 = vld [vmem:[#allocation5 + $0x50] sm:$0xf0] }
  0x33   :  { %v2803_v52 = vld [vmem:[#allocation1 + $0x12] sm:$0xff]  ;;  %v2805_v54 = vld [vmem:[#allocation1] sm:$0xff]  ;;  %v2408_v60 = vor.u32 %v2643_v49, %v2407_v48  ;;  %1349 = vmatpush.bf16.msrb.mxu2 %v2440_v53  ;;  %v2812_v4 = vld [vmem:[#allocation1 + $0x9] sm:$0xff]  ;;  %v1708_v47 = vor.u32 %v2465_v39, %v1705_v40 }
  0x34   :  { %v2807_v59 = vld [vmem:[#allocation1 + $0x1b] sm:$0xff]  ;;  %1355 = vmatpush.bf16.msrb.mxu3 %v1788_v45  ;;  %v2263_v62 = vld [vmem:[#allocation5 + $0x4a0] sm:$0xf]  ;;  %1298 = vmatmul.bf16.vlgmr.msra.gmra.mxu2 %v2803_v52  ;;  %v2497_v44 = vld [vmem:[#allocation5 + $0x144] sm:$0xf] }
  0x35   :  { %v2607_v63 = vld [vmem:[#allocation5 + $0x4ac] sm:$0xf0]  ;;  %v2391_v0 = vld [vmem:[#allocation5 + $0x5a0] sm:$0xf]  ;;  %1272 = vmatmul.bf16.vlgmr.msra.gmra.mxu0 %v2805_v54  ;;  %1311 = vmatmul.bf16.vlgmr.msra.gmra.mxu3 %v2807_v59  ;;  %v2815_v41 = vld [vmem:[#allocation1 + $0x36] sm:$0xff] }
  0x36   :  { %v2639_v1 = vld [vmem:[#allocation5 + $0x5ac] sm:$0xf0]  ;;  %1317 = vmatpush.bf16.msrb.mxu0 %v2280_v56  ;;  %v2264_v6 = vor.u32 %v2607_v63, %v2263_v62  ;;  %1330 = vmatpush.bf16.msrb.mxu1 %v2408_v60  ;;  %v2247_v11 = vld [vmem:[#allocation5 + $0x480] sm:$0xf]  ;;  %v1833_v45 = vld [vmem:[#allocation5 + $0x150] sm:$0xf0] }
  0x37   :  { %1368 = vmatpush.bf16.msra.mxu2 %v1916_v55  ;;  %v2392_v9 = vor.u32 %v2639_v1, %v2391_v0  ;;  %v2603_v12 = vld [vmem:[#allocation5 + $0x48c] sm:$0xf0]  ;;  %v2375_v13 = vld [vmem:[#allocation5 + $0x580] sm:$0xf]  ;;  %1285 = vmatmul.bf16.vlgmr.msra.gmra.mxu1 %v2812_v4  ;;  %v2461_v53 = vld [vmem:[#allocation5 + $0x24] sm:$0xf]  ;;  %v1836_v56 = vor.u32 %v2497_v44, %v1833_v45 }
  0x38   :  { %1356 = vmatpush.bf16.msrb.mxu3 %v1772_v61  ;;  %v2635_v14 = vld [vmem:[#allocation5 + $0x58c] sm:$0xf0]  ;;  %v2248_v18 = vor.u32 %v2603_v12, %v2247_v11  ;;  %v2231_v23 = vld [vmem:[#allocation5 + $0x460] sm:$0xf]  ;;  %v1689_v55 = vld [vmem:[#allocation5 + $0x30] sm:$0xf0] }
  0x39   :  { %v2376_v21 = vor.u32 %v2635_v14, %v2375_v13  ;;  %v2599_v24 = vld [vmem:[#allocation5 + $0x46c] sm:$0xf0]  ;;  %v2359_v25 = vld [vmem:[#allocation5 + $0x560] sm:$0xf]  ;;  %v2493_v58 = vld [vmem:[#allocation5 + $0x124] sm:$0xf]  ;;  %v1692_v63 = vor.u32 %v2461_v53, %v1689_v55 }
  0x3a   :  { %1318 = vmatpush.bf16.msrb.mxu0 %v2264_v6  ;;  %1331 = vmatpush.bf16.msrb.mxu1 %v2392_v9  ;;  %v2631_v26 = vld [vmem:[#allocation5 + $0x56c] sm:$0xf0]  ;;  %v2232_v30 = vor.u32 %v2599_v24, %v2231_v23  ;;  %v2215_v35 = vld [vmem:[#allocation5 + $0x440] sm:$0xf]  ;;  %v1817_v60 = vld [vmem:[#allocation5 + $0x130] sm:$0xf0] }
  0x3b   :  { %1369 = vmatpush.bf16.msra.mxu2 %v1900_v5  ;;  %v2360_v33 = vor.u32 %v2631_v26, %v2359_v25  ;;  %v2595_v36 = vld [vmem:[#allocation5 + $0x44c] sm:$0xf0]  ;;  %v2343_v37 = vld [vmem:[#allocation5 + $0x540] sm:$0xf]  ;;  %v2457_v3 = vld [vmem:[#allocation5 + $0x4] sm:$0xf] }
  0x3c   :  { %1357 = vmatpush.bf16.msrb.mxu3 %v1756_v10  ;;  %v2627_v38 = vld [vmem:[#allocation5 + $0x54c] sm:$0xf0]  ;;  %v2216_v43 = vor.u32 %v2595_v36, %v2215_v35  ;;  %v2199_v48 = vld [vmem:[#allocation5 + $0x420] sm:$0xf]  ;;  %v1673_v5 = vld [vmem:[#allocation5 + $0x10] sm:$0xf0]  ;;  %v1820_v10 = vor.u32 %v2493_v58, %v1817_v60 }
  0x3d   :  { %v2344_v46 = vor.u32 %v2627_v38, %v2343_v37  ;;  %v2591_v49 = vld [vmem:[#allocation5 + $0x42c] sm:$0xf0]  ;;  %v2327_v50 = vld [vmem:[#allocation5 + $0x520] sm:$0xf]  ;;  %v2549_v6 = vld [vmem:[#allocation5 + $0x2e4] sm:$0xf]  ;;  %v1676_v15 = vor.u32 %v2457_v3, %v1673_v5 }
  0x3e   :  { %1319 = vmatpush.bf16.msrb.mxu0 %v2248_v18  ;;  %1332 = vmatpush.bf16.msrb.mxu1 %v2376_v21  ;;  %v2623_v51 = vld [vmem:[#allocation5 + $0x52c] sm:$0xf0]  ;;  %v2200_v57 = vor.u32 %v2591_v49, %v2199_v48  ;;  %v2183_v61 = vld [vmem:[#allocation5 + $0x400] sm:$0xf]  ;;  %v2041_v7 = vld [vmem:[#allocation5 + $0x2f0] sm:$0xf0] }
  0x3f   :  { %1370 = vmatpush.bf16.msra.mxu2 %v1884_v17  ;;  %v2328_v62 = vor.u32 %v2623_v51, %v2327_v50  ;;  %v2587_v0 = vld [vmem:[#allocation5 + $0x40c] sm:$0xf0]  ;;  %v2311_v1 = vld [vmem:[#allocation5 + $0x500] sm:$0xf]  ;;  %v2581_v8 = vld [vmem:[#allocation5 + $0x3e4] sm:$0xf]  ;;  %v2044_v18 = vor.u32 %v2549_v6, %v2041_v7 }
  0x40   :  { %1358 = vmatpush.bf16.msrb.mxu3 %v1740_v22  ;;  %v2619_v2 = vld [vmem:[#allocation5 + $0x50c] sm:$0xf0]  ;;  %v2169_v9 = vld [vmem:[#allocation5 + $0x3f0] sm:$0xf0]  ;;  %v2184_v11 = vor.u32 %v2587_v0, %v2183_v61  ;;  %v2613_v12 = vld [vmem:[#allocation5 + $0x4e4] sm:$0xf] }
  0x41   :  { %v2297_v13 = vld [vmem:[#allocation5 + $0x4f0] sm:$0xf0]  ;;  %v2312_v14 = vor.u32 %v2619_v2, %v2311_v1  ;;  %v2489_v16 = vld [vmem:[#allocation5 + $0x104] sm:$0xf]  ;;  %v2172_v19 = vor.u32 %v2581_v8, %v2169_v9 }
  0x42   :  { %1320 = vmatpush.bf16.msrb.mxu0 %v2232_v30  ;;  %1333 = vmatpush.bf16.msrb.mxu1 %v2360_v33  ;;  %v1801_v17 = vld [vmem:[#allocation5 + $0x110] sm:$0xf0]  ;;  %v2645_v20 = vld [vmem:[#allocation5 + $0x5e4] sm:$0xf]  ;;  %v2300_v23 = vor.u32 %v2613_v12, %v2297_v13 }
  0x43   :  { %1371 = vmatpush.bf16.msra.mxu2 %v1868_v29  ;;  %v2425_v21 = vld [vmem:[#allocation5 + $0x5f0] sm:$0xf0]  ;;  %v2545_v22 = vld [vmem:[#allocation5 + $0x2c4] sm:$0xf]  ;;  %v1804_v28 = vor.u32 %v2489_v16, %v1801_v17 }
  0x44   :  { %1359 = vmatpush.bf16.msrb.mxu3 %v1724_v34  ;;  %2453 = vmatmul.msk.bf16.vlgmr.msrb.gmra.mxu2 %vm1261_vm0, %v2815_v41  ;;  %v2025_v24 = vld [vmem:[#allocation5 + $0x2d0] sm:$0xf0]  ;;  %v2577_v25 = vld [vmem:[#allocation5 + $0x3c4] sm:$0xf]  ;;  %v2428_v31 = vor.u32 %v2645_v20, %v2425_v21 }
  0x45   :  { %v2153_v26 = vld [vmem:[#allocation5 + $0x3d0] sm:$0xf0]  ;;  %v2609_v29 = vld [vmem:[#allocation5 + $0x4c4] sm:$0xf]  ;;  %v2028_v33 = vor.u32 %v2545_v22, %v2025_v24 }
  0x46   :  { %1321 = vmatpush.bf16.msrb.mxu0 %v2216_v43  ;;  %1334 = vmatpush.bf16.msrb.mxu1 %v2344_v46  ;;  %v2819_v27 = vld [vmem:[#allocation1 + $0x24] sm:$0xff]  ;;  %v2821_v32 = vld [vmem:[#allocation1 + $0x2d] sm:$0xff]  ;;  %v2156_v34 = vor.u32 %v2577_v25, %v2153_v26 }
  0x47   :  { %1372 = vmatpush.bf16.msra.mxu2 %v1852_v42  ;;  %v2281_v30 = vld [vmem:[#allocation5 + $0x4d0] sm:$0xf0]  ;;  %v2641_v35 = vld [vmem:[#allocation5 + $0x5c4] sm:$0xf] }
  0x48   :  { %1360 = vmatpush.bf16.msrb.mxu3 %v1708_v47  ;;  %v2409_v36 = vld [vmem:[#allocation5 + $0x5d0] sm:$0xf0]  ;;  %v2541_v37 = vld [vmem:[#allocation5 + $0x2a4] sm:$0xf]  ;;  %v2284_v38 = vor.u32 %v2609_v29, %v2281_v30 }
  0x49   :  { %v2009_v39 = vld [vmem:[#allocation5 + $0x2b0] sm:$0xf0]  ;;  %v2573_v40 = vld [vmem:[#allocation5 + $0x3a4] sm:$0xf]  ;;  %v2412_v45 = vor.u32 %v2641_v35, %v2409_v36 }
  0x4a   :  { %1322 = vmatpush.bf16.msrb.mxu0 %v2200_v57  ;;  %1335 = vmatpush.bf16.msrb.mxu1 %v2328_v62  ;;  %v2137_v42 = vld [vmem:[#allocation5 + $0x3b0] sm:$0xf0]  ;;  %v2605_v43 = vld [vmem:[#allocation5 + $0x4a4] sm:$0xf]  ;;  %v2012_v46 = vor.u32 %v2541_v37, %v2009_v39 }
  0x4b   :  { %1373 = vmatpush.bf16.msra.mxu2 %v1836_v56  ;;  %v2265_v44 = vld [vmem:[#allocation5 + $0x4b0] sm:$0xf0]  ;;  %v2140_v47 = vor.u32 %v2573_v40, %v2137_v42  ;;  %v2637_v48 = vld [vmem:[#allocation5 + $0x5a4] sm:$0xf] }
  0x4c   :  { %1361 = vmatpush.bf16.msrb.mxu3 %v1692_v63  ;;  %v2393_v49 = vld [vmem:[#allocation5 + $0x5b0] sm:$0xf0]  ;;  %v2537_v50 = vld [vmem:[#allocation5 + $0x284] sm:$0xf]  ;;  %v2268_v51 = vor.u32 %v2605_v43, %v2265_v44 }
  0x4d   :  { %v1993_v53 = vld [vmem:[#allocation5 + $0x290] sm:$0xf0]  ;;  %v2569_v55 = vld [vmem:[#allocation5 + $0x384] sm:$0xf]  ;;  %v2396_v60 = vor.u32 %v2637_v48, %v2393_v49  ;;  %v1791_v48 = vld [vmem:[#allocation5 + $0xe8] sm:$0xf] }
  0x4e   :  { %1323 = vmatpush.bf16.msrb.mxu0 %v2184_v11  ;;  %1336 = vmatpush.bf16.msrb.mxu1 %v2312_v14  ;;  %v2121_v56 = vld [vmem:[#allocation5 + $0x390] sm:$0xf0]  ;;  %v2601_v57 = vld [vmem:[#allocation5 + $0x484] sm:$0xf]  ;;  %v1996_v61 = vor.u32 %v2537_v50, %v1993_v53  ;;  %v2488_v49 = vld [vmem:[#allocation5 + $0xf4] sm:$0xf0] }
  0x4f   :  { %1374 = vmatpush.bf16.msra.mxu2 %v1820_v10  ;;  %v2249_v58 = vld [vmem:[#allocation5 + $0x490] sm:$0xf0]  ;;  %v2124_v62 = vor.u32 %v2569_v55, %v2121_v56  ;;  %v2633_v63 = vld [vmem:[#allocation5 + $0x584] sm:$0xf]  ;;  %v2047_v55 = vld [vmem:[#allocation5 + $0x2e8] sm:$0xf] }
  0x50   :  { %1362 = vmatpush.bf16.msrb.mxu3 %v1676_v15  ;;  %v2377_v0 = vld [vmem:[#allocation5 + $0x590] sm:$0xf0]  ;;  %v2533_v1 = vld [vmem:[#allocation5 + $0x264] sm:$0xf]  ;;  %v2252_v2 = vor.u32 %v2601_v57, %v2249_v58  ;;  %v2552_v56 = vld [vmem:[#allocation5 + $0x2f4] sm:$0xf0] }
  0x51   :  { %1324 = vmatmul.bf16.vlgmr.msrb.gmra.mxu0 %v2819_v27  ;;  %1337 = vmatmul.bf16.vlgmr.msrb.gmra.mxu1 %v2821_v32  ;;  %v1977_v3 = vld [vmem:[#allocation5 + $0x270] sm:$0xf0]  ;;  %v2565_v5 = vld [vmem:[#allocation5 + $0x364] sm:$0xf]  ;;  %v2380_v9 = vor.u32 %v2633_v63, %v2377_v0  ;;  %v1792_v63 = vor.u32 %v2488_v49, %v1791_v48  ;;  %v2175_v0 = vld [vmem:[#allocation5 + $0x3e8] sm:$0xf] }
  0x52   :  { %1381 = vmatpush.bf16.msra.mxu0 %v2044_v18  ;;  %1394 = vmatpush.bf16.msra.mxu1 %v2172_v19  ;;  %v2105_v6 = vld [vmem:[#allocation5 + $0x370] sm:$0xf0]  ;;  %v2597_v7 = vld [vmem:[#allocation5 + $0x464] sm:$0xf]  ;;  %v1980_v10 = vor.u32 %v2533_v1, %v1977_v3  ;;  %v2584_v1 = vld [vmem:[#allocation5 + $0x3f4] sm:$0xf0] }
  0x53   :  { %1375 = vmatpush.bf16.msra.mxu2 %v1804_v28  ;;  %1363 = vmatmul.bf16.vlgmr.msrb.gmra.mxu3 %v2805_v54  ;;  %v2233_v8 = vld [vmem:[#allocation5 + $0x470] sm:$0xf0]  ;;  %v2108_v11 = vor.u32 %v2565_v5, %v2105_v6  ;;  %v2629_v12 = vld [vmem:[#allocation5 + $0x564] sm:$0xf]  ;;  %v1919_v3 = vld [vmem:[#allocation5 + $0x1e8] sm:$0xf]  ;;  %v2048_v6 = vor.u32 %v2552_v56, %v2047_v55 }
  0x54   :  { %1407 = vmatpush.bf16.msra.mxu3 %v2300_v23  ;;  %v2361_v13 = vld [vmem:[#allocation5 + $0x570] sm:$0xf0]  ;;  %v2529_v14 = vld [vmem:[#allocation5 + $0x244] sm:$0xf]  ;;  %v2236_v15 = vor.u32 %v2597_v7, %v2233_v8  ;;  %v2520_v5 = vld [vmem:[#allocation5 + $0x1f4] sm:$0xf0] }
  0x55   :  { %v1961_v16 = vld [vmem:[#allocation5 + $0x250] sm:$0xf0]  ;;  %v2561_v17 = vld [vmem:[#allocation5 + $0x344] sm:$0xf]  ;;  %v2364_v21 = vor.u32 %v2629_v12, %v2361_v13  ;;  %v1775_v8 = vld [vmem:[#allocation5 + $0xc8] sm:$0xf]  ;;  %v1920_v13 = vor.u32 %v2520_v5, %v1919_v3 }
  0x56   :  { %1382 = vmatpush.bf16.msra.mxu0 %v2028_v33  ;;  %1395 = vmatpush.bf16.msra.mxu1 %v2156_v34  ;;  %v2089_v18 = vld [vmem:[#allocation5 + $0x350] sm:$0xf0]  ;;  %v2593_v19 = vld [vmem:[#allocation5 + $0x444] sm:$0xf]  ;;  %v1964_v22 = vor.u32 %v2529_v14, %v1961_v16  ;;  %v2548_v12 = vld [vmem:[#allocation5 + $0x2d4] sm:$0xf0] }
  0x57   :  { %1420 = vmatpush.bf16.msrb.mxu2 %v2428_v31  ;;  %v2217_v20 = vld [vmem:[#allocation5 + $0x450] sm:$0xf0]  ;;  %v2092_v23 = vor.u32 %v2561_v17, %v2089_v18  ;;  %v2625_v24 = vld [vmem:[#allocation5 + $0x544] sm:$0xf]  ;;  %v2159_v14 = vld [vmem:[#allocation5 + $0x3c8] sm:$0xf] }
  0x58   :  { %1408 = vmatpush.bf16.msra.mxu3 %v2284_v38  ;;  %1376 = vmatmul.bf16.vlgmr.msra.gmra.mxu2 %v2812_v4  ;;  %v2345_v25 = vld [vmem:[#allocation5 + $0x550] sm:$0xf0]  ;;  %v2525_v26 = vld [vmem:[#allocation5 + $0x224] sm:$0xf]  ;;  %v2220_v28 = vor.u32 %v2593_v19, %v2217_v20  ;;  %v1903_v17 = vld [vmem:[#allocation5 + $0x1c8] sm:$0xf] }
  0x59   :  { %v1945_v29 = vld [vmem:[#allocation5 + $0x230] sm:$0xf0]  ;;  %v2557_v30 = vld [vmem:[#allocation5 + $0x324] sm:$0xf]  ;;  %v2348_v35 = vor.u32 %v2625_v24, %v2345_v25  ;;  %v2516_v18 = vld [vmem:[#allocation5 + $0x1d4] sm:$0xf0] }
  0x5a   :  { %1383 = vmatpush.bf16.msra.mxu0 %v2012_v46  ;;  %1396 = vmatpush.bf16.msra.mxu1 %v2140_v47  ;;  %v2073_v31 = vld [vmem:[#allocation5 + $0x330] sm:$0xf0]  ;;  %v2589_v33 = vld [vmem:[#allocation5 + $0x424] sm:$0xf]  ;;  %v1948_v38 = vor.u32 %v2525_v26, %v1945_v29  ;;  %v1759_v20 = vld [vmem:[#allocation5 + $0xa8] sm:$0xf]  ;;  %v1904_v25 = vor.u32 %v2516_v18, %v1903_v17 }
  0x5b   :  { %1421 = vmatpush.bf16.msrb.mxu2 %v2412_v45  ;;  %v2201_v34 = vld [vmem:[#allocation5 + $0x430] sm:$0xf0]  ;;  %v2621_v36 = vld [vmem:[#allocation5 + $0x524] sm:$0xf]  ;;  %v2076_v39 = vor.u32 %v2557_v30, %v2073_v31  ;;  %v2544_v24 = vld [vmem:[#allocation5 + $0x2b4] sm:$0xf0] }
  0x5c   :  { %1409 = vmatpush.bf16.msra.mxu3 %v2268_v51  ;;  %v2329_v37 = vld [vmem:[#allocation5 + $0x530] sm:$0xf0]  ;;  %v2521_v40 = vld [vmem:[#allocation5 + $0x204] sm:$0xf]  ;;  %v2204_v44 = vor.u32 %v2589_v33, %v2201_v34  ;;  %v2143_v26 = vld [vmem:[#allocation5 + $0x3a8] sm:$0xf] }
  0x5d   :  { %v1929_v42 = vld [vmem:[#allocation5 + $0x210] sm:$0xf0]  ;;  %v2553_v43 = vld [vmem:[#allocation5 + $0x304] sm:$0xf]  ;;  %v2332_v51 = vor.u32 %v2621_v36, %v2329_v37  ;;  %v1887_v30 = vld [vmem:[#allocation5 + $0x1a8] sm:$0xf] }
  0x5e   :  { %1384 = vmatpush.bf16.msra.mxu0 %v1996_v61  ;;  %1397 = vmatpush.bf16.msra.mxu1 %v2124_v62  ;;  %v2057_v45 = vld [vmem:[#allocation5 + $0x310] sm:$0xf0]  ;;  %v2585_v46 = vld [vmem:[#allocation5 + $0x404] sm:$0xf]  ;;  %v1932_v57 = vor.u32 %v2521_v40, %v1929_v42  ;;  %v2512_v31 = vld [vmem:[#allocation5 + $0x1b4] sm:$0xf0] }
  0x5f   :  { %1422 = vmatpush.bf16.msrb.mxu2 %v2396_v60  ;;  %v2185_v47 = vld [vmem:[#allocation5 + $0x410] sm:$0xf0]  ;;  %v2649_v50 = vld [vmem:[#allocation5 + $0x604] sm:$0xf]  ;;  %v2060_v58 = vor.u32 %v2553_v43, %v2057_v45  ;;  %v1743_v34 = vld [vmem:[#allocation5 + $0x88] sm:$0xf] }
  0x60   :  { %1410 = vmatpush.bf16.msra.mxu3 %v2252_v2  ;;  %v2441_v53 = vld [vmem:[#allocation5 + $0x610] sm:$0xf0]  ;;  %v2617_v60 = vld [vmem:[#allocation5 + $0x504] sm:$0xf]  ;;  %v2188_v62 = vor.u32 %v2585_v46, %v2185_v47  ;;  %v1999_v37 = vld [vmem:[#allocation5 + $0x288] sm:$0xf] }
  0x61   :  { %v2313_v61 = vld [vmem:[#allocation5 + $0x510] sm:$0xf0]  ;;  %v2444_v2 = vor.u32 %v2649_v50, %v2441_v53  ;;  %v2127_v40 = vld [vmem:[#allocation5 + $0x388] sm:$0xf]  ;;  %v2572_v42 = vld [vmem:[#allocation5 + $0x394] sm:$0xf0] }
  0x62   :  { %1385 = vmatpush.bf16.msra.mxu0 %v1980_v10  ;;  %1398 = vmatpush.bf16.msra.mxu1 %v2108_v11  ;;  %v2316_v7 = vor.u32 %v2617_v60, %v2313_v61  ;;  %v2176_v10 = vor.u32 %v2584_v1, %v2175_v0  ;;  %v2031_v11 = vld [vmem:[#allocation5 + $0x2c8] sm:$0xf]  ;;  %v2508_v45 = vld [vmem:[#allocation5 + $0x194] sm:$0xf0]  ;;  %v2128_v49 = vor.u32 %v2572_v42, %v2127_v40  ;;  %v2486_v40 = vld [vmem:[#allocation5 + $0xec] sm:$0xf] }
  0x63   :  { %1423 = vmatpush.bf16.msrb.mxu2 %v2380_v9  ;;  %v2484_v9 = vld [vmem:[#allocation5 + $0xd4] sm:$0xf0]  ;;  %v2032_v19 = vor.u32 %v2548_v12, %v2031_v11  ;;  %v1727_v47 = vld [vmem:[#allocation5 + $0x68] sm:$0xf]  ;;  %v1793_v42 = vld [vmem:[#allocation5 + $0xf8] sm:$0xf0] }
  0x64   :  { %1411 = vmatpush.bf16.msra.mxu3 %v2236_v15  ;;  %v2580_v15 = vld [vmem:[#allocation5 + $0x3d4] sm:$0xf0]  ;;  %v1776_v16 = vor.u32 %v2484_v9, %v1775_v8  ;;  %v1983_v50 = vld [vmem:[#allocation5 + $0x268] sm:$0xf] }
  0x65   :  { %v2472_v48 = vld [vmem:[#allocation5 + $0x74] sm:$0xf0]  ;;  %v2111_v55 = vld [vmem:[#allocation5 + $0x368] sm:$0xf] }
  0x66   :  { %1386 = vmatpush.bf16.msra.mxu0 %v1964_v22  ;;  %1399 = vmatpush.bf16.msra.mxu1 %v2092_v23  ;;  %v2160_v22 = vor.u32 %v2580_v15, %v2159_v14  ;;  %v2015_v23 = vld [vmem:[#allocation5 + $0x2a8] sm:$0xf]  ;;  %v2568_v56 = vld [vmem:[#allocation5 + $0x374] sm:$0xf0] }
  0x67   :  { %1424 = vmatpush.bf16.msrb.mxu2 %v2364_v21  ;;  %v2480_v21 = vld [vmem:[#allocation5 + $0xb4] sm:$0xf0]  ;;  %v2016_v33 = vor.u32 %v2544_v24, %v2015_v23  ;;  %v2112_v0 = vor.u32 %v2568_v56, %v2111_v55  ;;  %v1967_v1 = vld [vmem:[#allocation5 + $0x248] sm:$0xf]  ;;  %v1796_v56 = vor.u32 %v2486_v40, %v1793_v42 }
  0x68   :  { %1412 = vmatpush.bf16.msra.mxu3 %v2220_v28  ;;  %v2576_v28 = vld [vmem:[#allocation5 + $0x3b4] sm:$0xf0]  ;;  %v1760_v29 = vor.u32 %v2480_v21, %v1759_v20  ;;  %v2095_v5 = vld [vmem:[#allocation5 + $0x348] sm:$0xf] }
  0x69   :  { %v2144_v36 = vor.u32 %v2576_v28, %v2143_v26  ;;  %v2504_v60 = vld [vmem:[#allocation5 + $0x174] sm:$0xf0]  ;;  %v1839_v8 = vld [vmem:[#allocation5 + $0x148] sm:$0xf] }
  0x6a   :  { %1387 = vmatpush.bf16.msra.mxu0 %v1948_v38  ;;  %1400 = vmatpush.bf16.msra.mxu1 %v2076_v39  ;;  %v2540_v38 = vld [vmem:[#allocation5 + $0x294] sm:$0xf0]  ;;  %v1888_v39 = vor.u32 %v2512_v31, %v1887_v30  ;;  %v1695_v11 = vld [vmem:[#allocation5 + $0x28] sm:$0xf] }
  0x6b   :  { %1425 = vmatpush.bf16.msrb.mxu2 %v2348_v35  ;;  %v2476_v35 = vld [vmem:[#allocation5 + $0x94] sm:$0xf0]  ;;  %v2000_v46 = vor.u32 %v2540_v38, %v1999_v37  ;;  %v1951_v14 = vld [vmem:[#allocation5 + $0x228] sm:$0xf] }
  0x6c   :  { %1413 = vmatpush.bf16.msra.mxu3 %v2204_v44  ;;  %v1744_v43 = vor.u32 %v2476_v35, %v1743_v34  ;;  %v1871_v44 = vld [vmem:[#allocation5 + $0x188] sm:$0xf]  ;;  %v2500_v9 = vld [vmem:[#allocation5 + $0x154] sm:$0xf0] }
  0x6d   :  { %v1872_v53 = vor.u32 %v2508_v45, %v1871_v44  ;;  %v2464_v12 = vld [vmem:[#allocation5 + $0x34] sm:$0xf0]  ;;  %v2079_v17 = vld [vmem:[#allocation5 + $0x328] sm:$0xf] }
  0x6e   :  { %1388 = vmatpush.bf16.msra.mxu0 %v1932_v57  ;;  %1401 = vmatpush.bf16.msra.mxu1 %v2060_v58  ;;  %v1728_v57 = vor.u32 %v2472_v48, %v1727_v47  ;;  %v1855_v58 = vld [vmem:[#allocation5 + $0x168] sm:$0xf]  ;;  %v2528_v15 = vld [vmem:[#allocation5 + $0x234] sm:$0xf0] }
  0x6f   :  { %1426 = vmatpush.bf16.msrb.mxu2 %v2332_v51  ;;  %v2536_v51 = vld [vmem:[#allocation5 + $0x274] sm:$0xf0]  ;;  %v1856_v3 = vor.u32 %v2504_v60, %v1855_v58  ;;  %v1823_v20 = vld [vmem:[#allocation5 + $0x128] sm:$0xf]  ;;  %v1952_v23 = vor.u32 %v2528_v15, %v1951_v14  ;;  %v2482_v58 = vld [vmem:[#allocation5 + $0xcc] sm:$0xf] }
  0x70   :  { %1414 = vmatpush.bf16.msra.mxu3 %v2188_v62  ;;  %v1984_v61 = vor.u32 %v2536_v51, %v1983_v50  ;;  %v1711_v62 = vld [vmem:[#allocation5 + $0x48] sm:$0xf]  ;;  %v2560_v18 = vld [vmem:[#allocation5 + $0x334] sm:$0xf0]  ;;  %v2518_v51 = vld [vmem:[#allocation5 + $0x1ec] sm:$0xf] }
  0x71   :  { %1389 = vmatmul.bf16.vlgmr.msra.gmra.mxu0 %v2803_v52  ;;  %1402 = vmatmul.bf16.vlgmr.msra.gmra.mxu1 %v2807_v59  ;;  %v2496_v21 = vld [vmem:[#allocation5 + $0x134] sm:$0xf0]  ;;  %v2080_v28 = vor.u32 %v2560_v18, %v2079_v17  ;;  %v1935_v30 = vld [vmem:[#allocation5 + $0x208] sm:$0xf]  ;;  %v1777_v60 = vld [vmem:[#allocation5 + $0xd8] sm:$0xf0] }
  0x72   :  { %1446 = vmatpush.bf16.msrb.mxu1 %v1792_v63  ;;  %1472 = vmatpush.bf16.msrb.mxu0 %v2048_v6  ;;  %v2468_v63 = vld [vmem:[#allocation5 + $0x54] sm:$0xf0]  ;;  %v1824_v34 = vor.u32 %v2496_v21, %v1823_v20  ;;  %v2431_v45 = vld [vmem:[#allocation5 + $0x5e8] sm:$0xf]  ;;  %v1889_v17 = vld [vmem:[#allocation5 + $0x1b8] sm:$0xf0] }
  0x73   :  { %1427 = vmatpush.bf16.msrb.mxu2 %v2316_v7  ;;  %1415 = vmatmul.bf16.vlgmr.msra.gmra.mxu3 %v2819_v27  ;;  %v2564_v6 = vld [vmem:[#allocation5 + $0x354] sm:$0xf0]  ;;  %v1712_v7 = vor.u32 %v2468_v63, %v1711_v62  ;;  %v2287_v47 = vld [vmem:[#allocation5 + $0x4c8] sm:$0xf]  ;;  %v1745_v20 = vld [vmem:[#allocation5 + $0x98] sm:$0xf0] }
  0x74   :  { %1440 = vmatpush.bf16.msrb.mxu3 %v2444_v2  ;;  %v2532_v2 = vld [vmem:[#allocation5 + $0x254] sm:$0xf0]  ;;  %v2415_v63 = vld [vmem:[#allocation5 + $0x5c8] sm:$0xf] }
  0x75   :  { %v2460_v24 = vld [vmem:[#allocation5 + $0x14] sm:$0xf0]  ;;  %v2255_v14 = vld [vmem:[#allocation5 + $0x488] sm:$0xf] }
  0x76   :  { %1447 = vmatpush.bf16.msrb.mxu1 %v1776_v16  ;;  %1428 = vmatmul.bf16.vlgmr.msrb.gmra.mxu2 %v2821_v32  ;;  %v1840_v16 = vor.u32 %v2500_v9, %v1839_v8  ;;  %v2616_v26 = vld [vmem:[#allocation5 + $0x4f4] sm:$0xf0]  ;;  %v2478_v8 = vld [vmem:[#allocation5 + $0xac] sm:$0xf]  ;;  %v1761_v9 = vld [vmem:[#allocation5 + $0xb8] sm:$0xf0] }
  0x77   :  { %1485 = vmatpush.bf16.msra.mxu2 %v2176_v10  ;;  %1473 = vmatpush.bf16.msrb.mxu0 %v2032_v19  ;;  %v1968_v10 = vor.u32 %v2532_v2, %v1967_v1  ;;  %v1696_v19 = vor.u32 %v2464_v12, %v1695_v11  ;;  %v2524_v31 = vld [vmem:[#allocation5 + $0x214] sm:$0xf0]  ;;  %v2271_v1 = vld [vmem:[#allocation5 + $0x4a8] sm:$0xf]  ;;  %v1764_v18 = vor.u32 %v2478_v8, %v1761_v9 }
  0x78   :  { %1459 = vmatpush.bf16.msra.mxu3 %v1920_v13  ;;  %v2096_v13 = vor.u32 %v2564_v6, %v2095_v5  ;;  %v2556_v35 = vld [vmem:[#allocation5 + $0x314] sm:$0xf0]  ;;  %v1936_v44 = vor.u32 %v2524_v31, %v1935_v30  ;;  %v1905_v5 = vld [vmem:[#allocation5 + $0x1d8] sm:$0xf0]  ;;  %v1780_v6 = vor.u32 %v2482_v58, %v1777_v60  ;;  %v2399_v12 = vld [vmem:[#allocation5 + $0x5a8] sm:$0xf] }
  0x79   :  { %v2652_v37 = vld [vmem:[#allocation5 + $0x614] sm:$0xf0]  ;;  %v2470_v30 = vld [vmem:[#allocation5 + $0x6c] sm:$0xf]  ;;  %v1729_v31 = vld [vmem:[#allocation5 + $0x78] sm:$0xf0] }
  0x7a   :  { %1448 = vmatpush.bf16.msrb.mxu1 %v1760_v29  ;;  %v1807_v29 = vld [vmem:[#allocation5 + $0x108] sm:$0xf]  ;;  %v2608_v2 = vld [vmem:[#allocation5 + $0x4b4] sm:$0xf0]  ;;  %v1732_v40 = vor.u32 %v2470_v30, %v1729_v31  ;;  %v1697_v58 = vld [vmem:[#allocation5 + $0x38] sm:$0xf0] }
  0x7b   :  { %1486 = vmatpush.bf16.msra.mxu2 %v2160_v22  ;;  %1474 = vmatpush.bf16.msrb.mxu0 %v2016_v33  ;;  %v1679_v22 = vld [vmem:[#allocation5 + $0x8] sm:$0xf]  ;;  %v2604_v15 = vld [vmem:[#allocation5 + $0x494] sm:$0xf0]  ;;  %v2161_v30 = vld [vmem:[#allocation5 + $0x3d8] sm:$0xf0] }
  0x7c   :  { %1460 = vmatpush.bf16.msra.mxu3 %v1904_v25  ;;  %v2303_v25 = vld [vmem:[#allocation5 + $0x4e8] sm:$0xf]  ;;  %v1680_v38 = vor.u32 %v2460_v24, %v1679_v22  ;;  %v2256_v21 = vor.u32 %v2604_v15, %v2255_v14  ;;  %v2636_v24 = vld [vmem:[#allocation5 + $0x594] sm:$0xf0]  ;;  %v2582_v14 = vld [vmem:[#allocation5 + $0x3ec] sm:$0xf] }
  0x7d   :  { %v2063_v33 = vld [vmem:[#allocation5 + $0x308] sm:$0xf]  ;;  %v2177_v15 = vld [vmem:[#allocation5 + $0x3f8] sm:$0xf0]  ;;  %v2610_v31 = vld [vmem:[#allocation5 + $0x4cc] sm:$0xf] }
  0x7e   :  { %1449 = vmatpush.bf16.msrb.mxu1 %v1744_v43  ;;  %v2304_v43 = vor.u32 %v2616_v26, %v2303_v25  ;;  %v2064_v48 = vor.u32 %v2556_v35, %v2063_v33  ;;  %v2600_v25 = vld [vmem:[#allocation5 + $0x474] sm:$0xf0]  ;;  %v1873_v26 = vld [vmem:[#allocation5 + $0x198] sm:$0xf0]  ;;  %v2319_v9 = vld [vmem:[#allocation5 + $0x508] sm:$0xf] }
  0x7f   :  { %1487 = vmatpush.bf16.msra.mxu2 %v2144_v36  ;;  %1475 = vmatpush.bf16.msrb.mxu0 %v2000_v46  ;;  %v2447_v36 = vld [vmem:[#allocation5 + $0x608] sm:$0xf]  ;;  %v2648_v46 = vld [vmem:[#allocation5 + $0x5f4] sm:$0xf0] }
  0x80   :  { %1461 = vmatpush.bf16.msra.mxu3 %v1888_v39  ;;  %v2492_v39 = vld [vmem:[#allocation5 + $0x114] sm:$0xf0]  ;;  %v2448_v50 = vor.u32 %v2652_v37, %v2447_v36  ;;  %v2223_v36 = vld [vmem:[#allocation5 + $0x448] sm:$0xf] }
  0x81   :  { %v1808_v55 = vor.u32 %v2492_v39, %v1807_v29  ;;  %v2632_v35 = vld [vmem:[#allocation5 + $0x574] sm:$0xf0]  ;;  %v1857_v39 = vld [vmem:[#allocation5 + $0x178] sm:$0xf0] }
  0x82   :  { %1450 = vmatpush.bf16.msrb.mxu1 %v1728_v57  ;;  %v2432_v57 = vor.u32 %v2648_v46, %v2431_v45  ;;  %v2596_v37 = vld [vmem:[#allocation5 + $0x454] sm:$0xf0] }
  0x83   :  { %1488 = vmatpush.bf16.msra.mxu2 %v2128_v49  ;;  %1476 = vmatpush.bf16.msrb.mxu0 %v1984_v61  ;;  %v2612_v49 = vld [vmem:[#allocation5 + $0x4d4] sm:$0xf0]  ;;  %v2224_v45 = vor.u32 %v2596_v37, %v2223_v36  ;;  %v2642_v36 = vld [vmem:[#allocation5 + $0x5cc] sm:$0xf]  ;;  %v2417_v37 = vld [vmem:[#allocation5 + $0x5d8] sm:$0xf0] }
  0x84   :  { %1462 = vmatpush.bf16.msra.mxu3 %v1872_v53  ;;  %v1921_v53 = vld [vmem:[#allocation5 + $0x1f8] sm:$0xf0]  ;;  %v2288_v61 = vor.u32 %v2612_v49, %v2287_v47  ;;  %v2351_v47 = vld [vmem:[#allocation5 + $0x548] sm:$0xf] }
  0x85   :  { %2454 = vmatmul.msk.bf16.vlgmr.msrb.gmra.mxu3 %vm1261_vm0, %v2815_v41  ;;  %v1924_v62 = vor.u32 %v2518_v51, %v1921_v53  ;;  %v2207_v49 = vld [vmem:[#allocation5 + $0x428] sm:$0xf]  ;;  %v2498_v51 = vld [vmem:[#allocation5 + $0x14c] sm:$0xf]  ;;  %v1841_v53 = vld [vmem:[#allocation5 + $0x158] sm:$0xf0] }
  0x86   :  { %1451 = vmatpush.bf16.msrb.mxu1 %v1712_v7 }
  0x87   :  { %1489 = vmatpush.bf16.msra.mxu2 %v2112_v0  ;;  %1477 = vmatpush.bf16.msrb.mxu0 %v1968_v10  ;;  %v2644_v0 = vld [vmem:[#allocation5 + $0x5d4] sm:$0xf0]  ;;  %v2272_v10 = vor.u32 %v2608_v2, %v2271_v1  ;;  %v2494_v2 = vld [vmem:[#allocation5 + $0x12c] sm:$0xf] }
  0x88   :  { %1463 = vmatpush.bf16.msra.mxu3 %v1856_v3  ;;  %v2514_v3 = vld [vmem:[#allocation5 + $0x1cc] sm:$0xf]  ;;  %v2416_v7 = vor.u32 %v2644_v0, %v2415_v63  ;;  %v2624_v63 = vld [vmem:[#allocation5 + $0x534] sm:$0xf0]  ;;  %v2191_v0 = vld [vmem:[#allocation5 + $0x408] sm:$0xf] }
  0x89   :  { %v1908_v11 = vor.u32 %v2514_v3, %v1905_v5  ;;  %v2588_v1 = vld [vmem:[#allocation5 + $0x414] sm:$0xf0]  ;;  %v1825_v3 = vld [vmem:[#allocation5 + $0x138] sm:$0xf0] }
  0x8a   :  { %1452 = vmatpush.bf16.msrb.mxu1 %v1696_v19  ;;  %v2474_v19 = vld [vmem:[#allocation5 + $0x8c] sm:$0xf] }
  0x8b   :  { %1490 = vmatpush.bf16.msra.mxu2 %v2096_v13  ;;  %1478 = vmatpush.bf16.msrb.mxu0 %v1952_v23  ;;  %v2640_v13 = vld [vmem:[#allocation5 + $0x5b4] sm:$0xf0]  ;;  %v2383_v23 = vld [vmem:[#allocation5 + $0x588] sm:$0xf] }
  0x8c   :  { %1464 = vmatpush.bf16.msra.mxu3 %v1840_v16  ;;  %v2510_v16 = vld [vmem:[#allocation5 + $0x1ac] sm:$0xf]  ;;  %v2384_v29 = vor.u32 %v2636_v24, %v2383_v23 }
  0x8d   :  { %v1892_v22 = vor.u32 %v2510_v16, %v1889_v17  ;;  %v2614_v17 = vld [vmem:[#allocation5 + $0x4ec] sm:$0xf] }
  0x8e   :  { %1453 = vmatpush.bf16.msrb.mxu1 %v1680_v38  ;;  %v2502_v38 = vld [vmem:[#allocation5 + $0x16c] sm:$0xf] }
  0x8f   :  { %1491 = vmatpush.bf16.msra.mxu2 %v2080_v28  ;;  %1479 = vmatpush.bf16.msrb.mxu0 %v1936_v44  ;;  %v1748_v28 = vor.u32 %v2474_v19, %v1745_v20  ;;  %v1713_v44 = vld [vmem:[#allocation5 + $0x58] sm:$0xf0]  ;;  %v1860_v46 = vor.u32 %v2502_v38, %v1857_v39  ;;  %v2646_v24 = vld [vmem:[#allocation5 + $0x5ec] sm:$0xf] }
  0x90   :  { %1465 = vmatpush.bf16.msra.mxu3 %v1824_v34  ;;  %v2367_v34 = vld [vmem:[#allocation5 + $0x568] sm:$0xf]  ;;  %v2033_v20 = vld [vmem:[#allocation5 + $0x2d8] sm:$0xf0] }
  0x91   :  { %1454 = vmatmul.bf16.vlgmr.msrb.gmra.mxu1 %v2805_v54  ;;  %v2506_v54 = vld [vmem:[#allocation5 + $0x18c] sm:$0xf]  ;;  %v2368_v42 = vor.u32 %v2632_v35, %v2367_v34  ;;  %v2017_v35 = vld [vmem:[#allocation5 + $0x2b8] sm:$0xf0] }
  0x92   :  { %1498 = vmatpush.bf16.msra.mxu1 %v2304_v43  ;;  %1480 = vmatmul.bf16.vlgmr.msrb.gmra.mxu0 %v2803_v52  ;;  %v2400_v52 = vor.u32 %v2640_v13, %v2399_v12  ;;  %v1876_v33 = vor.u32 %v2506_v54, %v1873_v26  ;;  %v2466_v43 = vld [vmem:[#allocation5 + $0x4c] sm:$0xf]  ;;  %v1828_v12 = vor.u32 %v2494_v2, %v1825_v3  ;;  %v2620_v13 = vld [vmem:[#allocation5 + $0x514] sm:$0xf0] }
  0x93   :  { %1492 = vmatpush.bf16.msra.mxu2 %v2064_v48  ;;  %1531 = vmatpush.bf16.msra.mxu0 %v2448_v50  ;;  %v2628_v48 = vld [vmem:[#allocation5 + $0x554] sm:$0xf0]  ;;  %v2320_v23 = vor.u32 %v2620_v13, %v2319_v9  ;;  %v2578_v26 = vld [vmem:[#allocation5 + $0x3cc] sm:$0xf] }
  0x94   :  { %1466 = vmatpush.bf16.msra.mxu3 %v1808_v55  ;;  %v2592_v50 = vld [vmem:[#allocation5 + $0x434] sm:$0xf0]  ;;  %v1716_v55 = vor.u32 %v2466_v43, %v1713_v44  ;;  %v2542_v34 = vld [vmem:[#allocation5 + $0x2ac] sm:$0xf]  ;;  %v2164_v38 = vor.u32 %v2578_v26, %v2161_v30  ;;  %v2145_v44 = vld [vmem:[#allocation5 + $0x3b8] sm:$0xf0] }
  0x95   :  { %v2208_v60 = vor.u32 %v2592_v50, %v2207_v49  ;;  %v2020_v43 = vor.u32 %v2542_v34, %v2017_v35  ;;  %v2659_v49 = vld [vmem:[#allocation1] sm:$0xff]  ;;  %v2638_v50 = vld [vmem:[#allocation5 + $0x5ac] sm:$0xf]  ;;  %v2225_v26 = vld [vmem:[#allocation5 + $0x458] sm:$0xf0] }
  0x96   :  { %1499 = vmatpush.bf16.msra.mxu1 %v2288_v61  ;;  %1493 = vmatmul.bf16.vlgmr.msra.gmra.mxu2 %v2807_v59  ;;  %v1844_v61 = vor.u32 %v2498_v51, %v1841_v53  ;;  %v2401_v51 = vld [vmem:[#allocation5 + $0x5b8] sm:$0xf0]  ;;  %v2566_v9 = vld [vmem:[#allocation5 + $0x36c] sm:$0xf] }
  0x97   :  { %1537 = vmatpush.bf16.msrb.mxu2 %v1796_v56  ;;  %1550 = vmatpush.bf16.msrb.mxu0 %v1924_v62  ;;  %v2352_v56 = vor.u32 %v2628_v48, %v2351_v47  ;;  %v2335_v62 = vld [vmem:[#allocation5 + $0x528] sm:$0xf]  ;;  %v2538_v47 = vld [vmem:[#allocation5 + $0x28c] sm:$0xf]  ;;  %v2001_v48 = vld [vmem:[#allocation5 + $0x298] sm:$0xf0] }
  0x98   :  { %1511 = vmatpush.bf16.msrb.mxu3 %v2432_v57  ;;  %v2462_v57 = vld [vmem:[#allocation5 + $0x2c] sm:$0xf]  ;;  %v2336_v8 = vor.u32 %v2624_v63, %v2335_v62  ;;  %v2660_v62 = vld [vmem:[#allocation1 + $0x9] sm:$0xff]  ;;  %v2404_v63 = vor.u32 %v2638_v50, %v2401_v51 }
  0x99   :  { %1467 = vmatmul.bf16.vlgmr.msra.gmra.mxu3 %v2812_v4  ;;  %v2239_v4 = vld [vmem:[#allocation5 + $0x468] sm:$0xf]  ;;  %v1700_v5 = vor.u32 %v2462_v57, %v1697_v58  ;;  %v2570_v57 = vld [vmem:[#allocation5 + $0x38c] sm:$0xf]  ;;  %v2004_v58 = vor.u32 %v2538_v47, %v2001_v48  ;;  %v1953_v30 = vld [vmem:[#allocation5 + $0x238] sm:$0xf0] }
  0x9a   :  { %1500 = vmatpush.bf16.msra.mxu1 %v2272_v10  ;;  %v2240_v59 = vor.u32 %v2600_v25, %v2239_v4  ;;  %v2458_v10 = vld [vmem:[#allocation5 + $0xc] sm:$0xf]  ;;  %v2433_v4 = vld [vmem:[#allocation5 + $0x5f8] sm:$0xf0]  ;;  %v2180_v25 = vor.u32 %v2582_v14, %v2177_v15 }
  0x9b   :  { %1538 = vmatpush.bf16.msrb.mxu2 %v1780_v6  ;;  %1551 = vmatpush.bf16.msrb.mxu0 %v1908_v11  ;;  %v2550_v6 = vld [vmem:[#allocation5 + $0x2ec] sm:$0xf]  ;;  %v1681_v11 = vld [vmem:[#allocation5 + $0x18] sm:$0xf0] }
  0x9c   :  { %1512 = vmatpush.bf16.msrb.mxu3 %v2416_v7  ;;  %v2049_v7 = vld [vmem:[#allocation5 + $0x2f8] sm:$0xf0]  ;;  %v1684_v19 = vor.u32 %v2458_v10, %v1681_v11  ;;  %v2530_v15 = vld [vmem:[#allocation5 + $0x24c] sm:$0xf] }
  0x9d   :  { %v2052_v16 = vor.u32 %v2550_v6, %v2049_v7  ;;  %v2385_v6 = vld [vmem:[#allocation5 + $0x598] sm:$0xf0] }
  0x9e   :  { %1501 = vmatpush.bf16.msra.mxu1 %v2256_v21  ;;  %v2490_v21 = vld [vmem:[#allocation5 + $0x10c] sm:$0xf]  ;;  %v2113_v11 = vld [vmem:[#allocation5 + $0x378] sm:$0xf0] }
  0x9f   :  { %1539 = vmatpush.bf16.msrb.mxu2 %v1764_v18  ;;  %1552 = vmatpush.bf16.msrb.mxu0 %v1892_v22  ;;  %v2305_v18 = vld [vmem:[#allocation5 + $0x4f8] sm:$0xf0] }
  0xa0   :  { %1513 = vmatpush.bf16.msrb.mxu3 %v2400_v52  ;;  %v2546_v52 = vld [vmem:[#allocation5 + $0x2cc] sm:$0xf]  ;;  %v1809_v22 = vld [vmem:[#allocation5 + $0x118] sm:$0xf0]  ;;  %v2308_v54 = vor.u32 %v2614_v17, %v2305_v18 }
  0xa1   :  { %v2630_v18 = vld [vmem:[#allocation5 + $0x56c] sm:$0xf]  ;;  %v2353_v34 = vld [vmem:[#allocation5 + $0x558] sm:$0xf0] }
  0xa2   :  { %1502 = vmatpush.bf16.msra.mxu1 %v2240_v59  ;;  %2455 = vmatmul.msk.bf16.vlgmr.msra.gmra.mxu0 %vm1261_vm0, %v2815_v41  ;;  %v2192_v41 = vor.u32 %v2588_v1, %v2191_v0  ;;  %v2289_v59 = vld [vmem:[#allocation5 + $0x4d8] sm:$0xf0]  ;;  %v2534_v0 = vld [vmem:[#allocation5 + $0x26c] sm:$0xf] }
  0xa3   :  { %1540 = vmatpush.bf16.msrb.mxu2 %v1748_v28  ;;  %1553 = vmatpush.bf16.msrb.mxu0 %v1876_v33  ;;  %v2036_v28 = vor.u32 %v2546_v52, %v2033_v20  ;;  %v2436_v33 = vor.u32 %v2646_v24, %v2433_v4  ;;  %v2292_v39 = vor.u32 %v2610_v31, %v2289_v59  ;;  %v1985_v1 = vld [vmem:[#allocation5 + $0x278] sm:$0xf0] }
  0xa4   :  { %1514 = vmatpush.bf16.msrb.mxu3 %v2384_v29  ;;  %v1812_v29 = vor.u32 %v2490_v21, %v1809_v22  ;;  %v1988_v10 = vor.u32 %v2534_v0, %v1985_v1  ;;  %v2369_v52 = vld [vmem:[#allocation5 + $0x578] sm:$0xf0]  ;;  %v2116_v20 = vor.u32 %v2566_v9, %v2113_v11  ;;  %v2562_v22 = vld [vmem:[#allocation5 + $0x34c] sm:$0xf]  ;;  %v2663_v9 = vld [vmem:[#allocation1 + $0x24] sm:$0xff] }
  0xa5   :  { %v2337_v48 = vld [vmem:[#allocation5 + $0x538] sm:$0xf0]  ;;  %v2618_v0 = vld [vmem:[#allocation5 + $0x50c] sm:$0xf] }
  0xa6   :  { %1503 = vmatpush.bf16.msra.mxu1 %v2224_v45  ;;  %v2606_v45 = vld [vmem:[#allocation5 + $0x4ac] sm:$0xf]  ;;  %v2449_v50 = vld [vmem:[#allocation5 + $0x618] sm:$0xf0] }
  0xa7   :  { %1541 = vmatpush.bf16.msrb.mxu2 %v1732_v40  ;;  %1554 = vmatpush.bf16.msrb.mxu0 %v1860_v46  ;;  %v2574_v40 = vld [vmem:[#allocation5 + $0x3ac] sm:$0xf]  ;;  %v2273_v46 = vld [vmem:[#allocation5 + $0x4b8] sm:$0xf0] }
  0xa8   :  { %1515 = vmatpush.bf16.msrb.mxu3 %v2368_v42  ;;  %v2840_v42 = vld [vmem:[#allocation7] sm:$0xf]  ;;  %v2321_v1 = vld [vmem:[#allocation5 + $0x518] sm:$0xf0] }
  0xa9   :  { %v258_v53 = vperm.slane %v2840_v42, 0 }
  0xaa   :  { %1504 = vmatpush.bf16.msra.mxu1 %v2208_v60  ;;  %v2129_v60 = vld [vmem:[#allocation5 + $0x398] sm:$0xf0] }
  0xab   :  { %1542 = vmatpush.bf16.msrb.mxu2 %v1716_v55  ;;  %1555 = vmatpush.bf16.msrb.mxu0 %v1844_v61  ;;  %v2148_v55 = vor.u32 %v2574_v40, %v2145_v44  ;;  %v2602_v61 = vld [vmem:[#allocation5 + $0x48c] sm:$0xf]  ;;  %v2132_v7 = vor.u32 %v2570_v57, %v2129_v60 }
  0xac   :  { %1516 = vmatpush.bf16.msrb.mxu3 %v2352_v56  ;;  %v2276_v56 = vor.u32 %v2606_v45, %v2273_v46  ;;  %v2590_v40 = vld [vmem:[#allocation5 + $0x42c] sm:$0xf]  ;;  %v1937_v46 = vld [vmem:[#allocation5 + $0x218] sm:$0xf0] }
  0xad   :  { %v2522_v45 = vld [vmem:[#allocation5 + $0x20c] sm:$0xf] }
  0xae   :  { %1505 = vmatpush.bf16.msra.mxu1 %v2192_v41  ;;  %v2598_v41 = vld [vmem:[#allocation5 + $0x46c] sm:$0xf] }
  0xaf   :  { %1543 = vmatpush.bf16.msrb.mxu2 %v1700_v5  ;;  %1556 = vmatpush.bf16.msrb.mxu0 %v1828_v12  ;;  %v2634_v5 = vld [vmem:[#allocation5 + $0x58c] sm:$0xf]  ;;  %v2241_v12 = vld [vmem:[#allocation5 + $0x478] sm:$0xf0] }
  0xb0   :  { %1517 = vmatpush.bf16.msrb.mxu3 %v2336_v8  ;;  %v2388_v13 = vor.u32 %v2634_v5, %v2385_v6  ;;  %v2244_v21 = vor.u32 %v2598_v41, %v2241_v12  ;;  %v2554_v57 = vld [vmem:[#allocation5 + $0x30c] sm:$0xf]  ;;  %v2324_v5 = vor.u32 %v2618_v0, %v2321_v1  ;;  %v2661_v6 = vld [vmem:[#allocation1 + $0x12] sm:$0xff]  ;;  %v261_v1 = vperm.slane %v2840_v42, 3 }
  0xb1   :  { %1506 = vmatmul.bf16.vlgmr.msra.gmra.mxu1 %v2819_v27  ;;  %v2420_v27 = vor.u32 %v2642_v36, %v2417_v37  ;;  %v2558_v37 = vld [vmem:[#allocation5 + $0x32c] sm:$0xf] }
  0xb2   :  { %1563 = vmatpush.bf16.msrb.mxu1 %v2052_v16  ;;  %v1273_v2 = vpop.f32.mrf.mxu0  ;;  %v1969_v16 = vld [vmem:[#allocation5 + $0x258] sm:$0xf0] }
  0xb3   :  { %1544 = vmatpush.bf16.msrb.mxu2 %v1684_v19  ;;  %1557 = vmatpush.bf16.msrb.mxu0 %v1812_v29  ;;  %v1274_v3 = vadd.f32 %v1273_v2, %v258_v53  ;;  %v2526_v29 = vld [vmem:[#allocation5 + $0x22c] sm:$0xf] }
  0xb4   :  { %1518 = vmatpush.bf16.msrb.mxu3 %v2320_v23  ;;  %v1286_v14 = vpop.f32.mrf.mxu1  ;;  %v1972_v23 = vor.u32 %v2530_v15, %v1969_v16  ;;  %v259_v16 = vperm.slane %v2840_v42, 1 }
  0xb5   :  { %v1287_v17 = vadd.f32 %v1286_v14, %v1274_v3 }
  0xb6   :  { %1564 = vmatpush.bf16.msrb.mxu1 %v2036_v28  ;;  %1545 = vmatmul.bf16.vlgmr.msrb.gmra.mxu2 %v2659_v49  ;;  %v2372_v28 = vor.u32 %v2630_v18, %v2369_v52  ;;  %v2650_v49 = vld [vmem:[#allocation5 + $0x60c] sm:$0xf] }
  0xb7   :  { %1589 = vmatpush.bf16.msra.mxu2 %v2308_v54  ;;  %1519 = vmatmul.bf16.vlgmr.msrb.gmra.mxu3 %v2821_v32  ;;  %v2257_v32 = vld [vmem:[#allocation5 + $0x498] sm:$0xf0]  ;;  %v1299_v19 = vpop.f32.mrf.mxu2  ;;  %v2594_v54 = vld [vmem:[#allocation5 + $0x44c] sm:$0xf] }
  0xb8   :  { %1576 = vmatpush.bf16.msra.mxu3 %v2180_v25  ;;  %1602 = vmatpush.bf16.msra.mxu0 %v2436_v33  ;;  %v2260_v8 = vor.u32 %v2602_v61, %v2257_v32  ;;  %v1300_v24 = vadd.f32 %v1299_v19, %v1287_v17  ;;  %v1312_v4 = vpop.f32.mrf.mxu3  ;;  %v2097_v25 = vld [vmem:[#allocation5 + $0x358] sm:$0xf0]  ;;  %v2626_v33 = vld [vmem:[#allocation5 + $0x54c] sm:$0xf]  ;;  %v2228_v36 = vor.u32 %v2594_v54, %v2225_v26 }
  0xb9   :  { %1558 = vmatmul.bf16.vlgmr.msrb.gmra.mxu0 %v2660_v62  ;;  %v2100_v35 = vor.u32 %v2562_v22, %v2097_v25  ;;  %v2356_v44 = vor.u32 %v2626_v33, %v2353_v34  ;;  %v2586_v32 = vld [vmem:[#allocation5 + $0x40c] sm:$0xf]  ;;  %v2193_v62 = vld [vmem:[#allocation5 + $0x418] sm:$0xf0] }
  0xba   :  { %1565 = vmatpush.bf16.msrb.mxu1 %v2020_v43  ;;  %v1275_v31 = vpop.f32.mrf.mxu0  ;;  %v1313_v59 = vadd.f32 %v1312_v4, %v1300_v24  ;;  %v2209_v43 = vld [vmem:[#allocation5 + $0x438] sm:$0xf0]  ;;  %v2196_v3 = vor.u32 %v2586_v32, %v2193_v62  ;;  %v2665_v52 = vld [vmem:[#allocation1 + $0x36] sm:$0xff] }
  0xbb   :  { %1590 = vmatpush.bf16.msra.mxu2 %v2292_v39  ;;  %v2081_v39 = vld [vmem:[#allocation5 + $0x338] sm:$0xf0] }
  0xbc   :  { %1577 = vmatpush.bf16.msra.mxu3 %v2164_v38  ;;  %1603 = vmatpush.bf16.msra.mxu0 %v2420_v27  ;;  %v1956_v38 = vor.u32 %v2526_v29, %v1953_v30  ;;  %v2622_v27 = vld [vmem:[#allocation5 + $0x52c] sm:$0xf]  ;;  %v1288_v47 = vpop.f32.mrf.mxu1  ;;  %v2084_v53 = vor.u32 %v2558_v37, %v2081_v39 }
  0xbd   :  { %v2340_v61 = vor.u32 %v2622_v27, %v2337_v48 }
  0xbe   :  { %1566 = vmatpush.bf16.msrb.mxu1 %v2004_v58  ;;  %v2065_v58 = vld [vmem:[#allocation5 + $0x318] sm:$0xf0] }
  0xbf   :  { %1591 = vmatpush.bf16.msra.mxu2 %v2276_v56  ;;  %v1301_v51 = vpop.f32.mrf.mxu2  ;;  %v1940_v56 = vor.u32 %v2522_v45, %v1937_v46  ;;  %v2068_v2 = vor.u32 %v2554_v57, %v2065_v58 }
  0xc0   :  { %1578 = vmatpush.bf16.msra.mxu3 %v2148_v55  ;;  %1604 = vmatpush.bf16.msra.mxu0 %v2404_v63  ;;  %v2212_v55 = vor.u32 %v2590_v40, %v2209_v43  ;;  %v1314_v60 = vpop.f32.mrf.mxu3  ;;  %v2452_v63 = vor.u32 %v2650_v49, %v2449_v50 }
  0xc2   :  { %1567 = vmatpush.bf16.msrb.mxu1 %v1988_v10  ;;  %v2664_v10 = vld [vmem:[#allocation1 + $0x2d] sm:$0xff] }
  0xc3   :  { %1592 = vmatpush.bf16.msra.mxu2 %v2260_v8  ;;  %v2662_v8 = vld [vmem:[#allocation1 + $0x1b] sm:$0xff] }
  0xc4   :  { %1579 = vmatpush.bf16.msra.mxu3 %v2132_v7  ;;  %1605 = vmatpush.bf16.msra.mxu0 %v2388_v13 }
  0xc6   :  { %1568 = vmatpush.bf16.msrb.mxu1 %v1972_v23 }
  0xc7   :  { %1593 = vmatpush.bf16.msra.mxu2 %v2244_v21  ;;  %v1351_v7 = vpop.f32.mrf.mxu2 }
  0xc8   :  { %1580 = vmatpush.bf16.msra.mxu3 %v2116_v20  ;;  %1606 = vmatpush.bf16.msra.mxu0 %v2372_v28 }
  0xca   :  { %1569 = vmatpush.bf16.msrb.mxu1 %v1956_v38 }
  0xcb   :  { %1594 = vmatpush.bf16.msra.mxu2 %v2228_v36 }
  0xcc   :  { %1581 = vmatpush.bf16.msra.mxu3 %v2100_v35  ;;  %1607 = vmatpush.bf16.msra.mxu0 %v2356_v44 }
  0xce   :  { %1570 = vmatpush.bf16.msrb.mxu1 %v1940_v56  ;;  %v1325_v11 = vpop.f32.mrf.mxu0  ;;  %v1338_v12 = vpop.f32.mrf.mxu1 }
  0xcf   :  { %1595 = vmatpush.bf16.msra.mxu2 %v2212_v55  ;;  %v1326_v41 = vadd.f32 %v1325_v11, %v1313_v59  ;;  %v1353_v13 = vpop.f32.mrf.mxu2 }
  0xd0   :  { %1582 = vmatpush.bf16.msra.mxu3 %v2084_v53  ;;  %1608 = vmatpush.bf16.msra.mxu0 %v2340_v61 }
  0xd1   :  { %1571 = vmatmul.bf16.vlgmr.msrb.gmra.mxu1 %v2661_v6  ;;  %v1339_v14 = vadd.f32 %v1338_v12, %v1326_v41 }
  0xd2   :  { %1622 = vmatpush.bf16.msra.mxu1 %v2452_v63  ;;  %v260_v63 = vperm.slane %v2840_v42, 2 }
  0xd3   :  { %1596 = vmatpush.bf16.msra.mxu2 %v2196_v3  ;;  %v1352_v15 = vadd.f32 %v1351_v7, %v1339_v14 }
  0xd4   :  { %1583 = vmatpush.bf16.msra.mxu3 %v2068_v2  ;;  %1609 = vmatpush.bf16.msra.mxu0 %v2324_v5 }
  0xd5   :  { %v1628_v38 = vmax.f32 %v1352_v15, 0.0 }
  0xd6   :  { %1597 = vmatmul.bf16.vlgmr.msra.gmra.mxu2 %v2663_v9  ;;  %v1364_v17 = vpop.f32.mrf.mxu3  ;;  %v1327_v18 = vpop.f32.mrf.mxu0 }
  0xd7   :  { %1584 = vmatmul.bf16.vlgmr.msra.gmra.mxu3 %v2662_v8  ;;  %1610 = vmatmul.bf16.vlgmr.msra.gmra.mxu0 %v2664_v10  ;;  %v1365_v19 = vadd.f32 %v1364_v17, %v259_v16  ;;  %v1340_v20 = vpop.f32.mrf.mxu1 }
  0xdb   :  { %v1377_v21 = vpop.f32.mrf.mxu2 }
  0xdc   :  { %v1378_v22 = vadd.f32 %v1377_v21, %v1365_v19 }
  0xde   :  { %v1366_v23 = vpop.f32.mrf.mxu3 }
  0xe1   :  { %2456 = vmatmul.msk.bf16.vlgmr.msra.gmra.mxu1 %vm1261_vm0, %v2665_v52 }
  0xe3   :  { %v1379_v24 = vpop.f32.mrf.mxu2 }
  0xee   :  { %v1390_v4 = vpop.f32.mrf.mxu0  ;;  %v1403_v54 = vpop.f32.mrf.mxu1 }
  0xef   :  { %v1391_v25 = vadd.f32 %v1390_v4, %v1378_v22 }
  0xf1   :  { %v1404_v26 = vadd.f32 %v1403_v54, %v1391_v25 }
  0xf6   :  { %v1416_v28 = vpop.f32.mrf.mxu3  ;;  %v1392_v30 = vpop.f32.mrf.mxu0 }
  0xf7   :  { %v1417_v29 = vadd.f32 %v1416_v28, %v1404_v26  ;;  %v1405_v33 = vpop.f32.mrf.mxu1 }
  0xf9   :  { %v1429_v31 = vpop.f32.mrf.mxu2 }
  0xfa   :  { %v1430_v59 = vadd.f32 %v1429_v31, %v1417_v29 }
  0xfe   :  { %v1418_v34 = vpop.f32.mrf.mxu3 }
 0x101   :  { %v1431_v35 = vpop.f32.mrf.mxu2 }
 0x108   :  { %v1442_v36 = vpop.f32.mrf.mxu3 }
 0x109   :  { %v1443_v37 = vadd.f32 %v1442_v36, %v1430_v59 }
 0x10b   :  { %v1629_v39 = vmax.f32 %v1443_v37, 0.0 }
 0x10d   :  { %v1632_v40 = vpack.c.bf16 %v1629_v39, %v1628_v38 }
 0x10e   :  { %v1455_v45 = vpop.f32.mrf.mxu1 }
 0x10f   :  { %v1481_v44 = vpop.f32.mrf.mxu0  ;;  %v1456_v0 = vadd.f32 %v1455_v45, %v260_v63  ;;  %v1636_v24 = vrot.slane %v1632_v40, 3 }
 0x110   :  { %v1444_v43 = vpop.f32.mrf.mxu3 }
 0x111   :  { %v1642_v28 = vsel %vm1639_vm1, %v1632_v40, %v1636_v24 }
 0x116   :  { %v1457_v48 = vpop.f32.mrf.mxu1 }
 0x117   :  { %v1483_v27 = vpop.f32.mrf.mxu0 }
 0x119   :  { %v1494_v47 = vpop.f32.mrf.mxu2 }
 0x11c   :  { %v1468_v46 = vpop.f32.mrf.mxu3 }
 0x11d   :  { %v1469_v2 = vadd.f32 %v1468_v46, %v1456_v0 }
 0x11f   :  { %v1533_v50 = vpop.f32.mrf.mxu0  ;;  %v1482_v6 = vadd.f32 %v1481_v44, %v1469_v2 }
 0x121   :  { %v1496_v51 = vpop.f32.mrf.mxu2  ;;  %v1495_v9 = vadd.f32 %v1494_v47, %v1482_v6 }
 0x124   :  { %v1470_v49 = vpop.f32.mrf.mxu3 }
 0x127   :  { %v1535_v53 = vpop.f32.mrf.mxu0 }
 0x12e   :  { %v1507_v55 = vpop.f32.mrf.mxu1 }
 0x12f   :  { %v1508_v41 = vadd.f32 %v1507_v55, %v1495_v9 }
 0x136   :  { %v1559_v56 = vpop.f32.mrf.mxu0  ;;  %v1509_v57 = vpop.f32.mrf.mxu1 }
 0x139   :  { %v1546_v60 = vpop.f32.mrf.mxu2 }
 0x13a   :  { %v1520_v58 = vpop.f32.mrf.mxu3  ;;  %v1547_v3 = vadd.f32 %v1546_v60, %v261_v1 }
 0x13b   :  { %v1521_v15 = vadd.f32 %v1520_v58, %v1508_v41 }
 0x13c   :  { %v1560_v7 = vadd.f32 %v1559_v56, %v1547_v3 }
 0x13d   :  { %v1534_v52 = vadd.f32 %v1533_v50, %v1521_v15 }
 0x13e   :  { %v1561_v61 = vpop.f32.mrf.mxu0 }
 0x13f   :  { %v1630_v22 = vmax.f32 %v1534_v52, 0.0 }
 0x141   :  { %v1548_v62 = vpop.f32.mrf.mxu2 }
 0x142   :  { %v1522_v32 = vpop.f32.mrf.mxu3 }
 0x14e   :  { %v1572_v5 = vpop.f32.mrf.mxu1 }
 0x14f   :  { %v1573_v10 = vadd.f32 %v1572_v5, %v1560_v7 }
 0x154   :  { %v1611_v8 = vpop.f32.mrf.mxu0 }
 0x156   :  { %v1574_v11 = vpop.f32.mrf.mxu1 }
 0x159   :  { %v1598_v14 = vpop.f32.mrf.mxu2 }
 0x15a   :  { %v1585_v12 = vpop.f32.mrf.mxu3 }
 0x15b   :  { %v1586_v13 = vadd.f32 %v1585_v12, %v1573_v10 }
 0x15c   :  { %v1613_v17 = vpop.f32.mrf.mxu0 }
 0x15d   :  { %v1599_v16 = vadd.f32 %v1598_v14, %v1586_v13 }
 0x15e   :  { %v1624_v19 = vpop.f32.mrf.mxu1 }
 0x15f   :  { %v1612_v18 = vadd.f32 %v1611_v8, %v1599_v16 }
 0x161   :  { %v1625_v42 = vadd.f32 %v1624_v19, %v1612_v18  ;;  %v1600_v21 = vpop.f32.mrf.mxu2 }
 0x162   :  { %v1587_v20 = vpop.f32.mrf.mxu3 }
 0x163   :  { %v1631_v23 = vmax.f32 %v1625_v42, 0.0 }
 0x165   :  { %v1633_v4 = vpack.c.bf16 %v1631_v23, %v1630_v22 }
 0x166   :  { %v1626_v26 = vpop.f32.mrf.mxu1 }
 0x167   :  { %v1637_v25 = vrot.slane %v1633_v4, 6  ;;  %v1638_v54 = vrot.slane %v1633_v4, 1 }
 0x169   :  { %v1646_v29 = vsel %vm1643_vm2, %v1637_v25, %v1638_v54 }
 0x16a   :  { %v1648_v30 = vsel %vm1647_vm3, %v1642_v28, %v1646_v29 }
 0x16b   :  { %1650 = vst [vmem:[#allocation8] sm:$0xf] %v1648_v30 }
 0x16c   :  { %1661 = dma.vmem_to_hbm [thread:$0]  %s1657_s2, 64, %s1659_s30, [#allocation4]  }
 0x16d   :  { %2766 = dma.done.wait [#allocation4], 64  }
 0x16e   :  { %2767 = vsyncadd [#allocation4], 4294967232 }
 0x16f   :  { %1666 = vsyncpa [#allocation3], 1 }
 0x170   :  { %1667 = vsyncpa [#allocation6], 1 }
 0x171   :  { %1668 = vsyncpa [#allocation4], 1 }

</bundles_post_ra>
